<compile_context>
chip_gen: v7x
topology: tpu7x:2x2x1
jax: 0.10.0
libtpu: 0.0.40
codegen_flags: <defaults>
</compile_context>

<pallas_src>
import math

import jax
import jax.numpy as jnp
from jax.experimental import pallas as pl
from jax.experimental.pallas import tpu as pltpu  # noqa: F401  (TPU backend assumed)

HIDDEN = 32
N_HEADS = 2
HEAD_DIM = HIDDEN // N_HEADS
INTERMEDIATE = 64
N_LAYERS = 2
VOCAB = 100
MAX_POS = 32
TYPE_VOCAB = 2
LN_EPS = 1e-5
HEAD_PAD = 128          # lane-dense padded width for the span-head output


def _layer_norm(x, g, b, eps=LN_EPS):
    mu = jnp.mean(x, axis=-1, keepdims=True)
    var = jnp.mean((x - mu) ** 2, axis=-1, keepdims=True)
    return (x - mu) * jax.lax.rsqrt(var + eps) * g + b


# ----------------------------- fused forward kernel -------------------------

def tweet_fwd_kernel(x_ref, mask_ref,
                     wqkv_ref, bqkv_ref, wo_ref, bo_ref,
                     wi_ref, bi_ref, wp_ref, bp_ref,
                     ln_ref, whead_ref, bhead_ref,
                     out_ref):
    # Shapes (all static):
    #   x_ref    : (B*S, H)        summed embeddings (pre-LayerNorm)
    #   mask_ref : (B, 1, S)       additive key mask (-1e4 on padding)
    #   wqkv_ref : (L*3*NH, H, HD) per-head q/k/v weights (proj-major, head-minor)
    #   bqkv_ref : (L*3*NH, 1, HD)
    #   wo_ref   : (L*NH, HD, H)   per-head rows of the output projection
    #   bo_ref   : (L, 1, H)
    #   wi_ref   : (L, H, I), bi_ref: (L, 1, I)
    #   wp_ref   : (L, I, H), bp_ref: (L, 1, H)
    #   ln_ref   : (2 + 4*L, 1, H) [emb_g, emb_b, (ln1g, ln1b, ln2g, ln2b)*L]
    #   whead_ref: (2, H, HEAD_PAD)  [0]: rows for h_last, [1]: rows for h_prev
    #   bhead_ref: (1, HEAD_PAD)
    #   out_ref  : (B*S, HEAD_PAD)   lane-dense logits (only cols 0/1 are real)
    B = mask_ref.shape[0]
    S = mask_ref.shape[2]
    scale = 1.0 / math.sqrt(HEAD_DIM)

    # embeddings LayerNorm
    x = _layer_norm(x_ref[...], ln_ref[0], ln_ref[1])            # (B*S, H) f32

    h_prev = x
    for l in range(N_LAYERS):                                    # static unroll
        if l == N_LAYERS - 1:
            h_prev = x        # hidden_states[-2] == input of the last layer

        # ---- self-attention: per-head pre-split weights -> no lane slicing,
        #      no lane-axis concat; heads accumulate through the O-projection.
        attn = jnp.zeros_like(x)
        for h in range(N_HEADS):                                 # static unroll
            base = l * 3 * N_HEADS + h
            q = jnp.dot(x, wqkv_ref[base],
                        preferred_element_type=jnp.float32) + bqkv_ref[base]
            k = jnp.dot(x, wqkv_ref[base + N_HEADS],
                        preferred_element_type=jnp.float32) + bqkv_ref[base + N_HEADS]
            v = jnp.dot(x, wqkv_ref[base + 2 * N_HEADS],
                        preferred_element_type=jnp.float32) + bqkv_ref[base + 2 * N_HEADS]
            ctx_rows = []
            for b in range(B):                                   # static; B tiny
                qb = q[b * S:(b + 1) * S, :]                     # sublane slice
                kb = k[b * S:(b + 1) * S, :]
                vb = v[b * S:(b + 1) * S, :]
                s = jnp.dot(qb, kb.T, preferred_element_type=jnp.float32) * scale
                s = s + mask_ref[b]                              # (1, S) mask
                s = s - jnp.max(s, axis=-1, keepdims=True)
                p = jnp.exp(s)
                p = p * pl.reciprocal(jnp.sum(p, axis=-1, keepdims=True),
                                      approx=True)
                ctx_rows.append(jnp.dot(p, vb,
                                        preferred_element_type=jnp.float32))
            ctx = jnp.concatenate(ctx_rows, axis=0)              # sublane concat
            attn = attn + jnp.dot(ctx, wo_ref[l * N_HEADS + h],
                                  preferred_element_type=jnp.float32)
        attn = attn + bo_ref[l]

        ln_base = 2 + 4 * l
        y = _layer_norm(attn + x, ln_ref[ln_base + 0], ln_ref[ln_base + 1])

        # ---- FFN
        h1 = jnp.dot(y, wi_ref[l], preferred_element_type=jnp.float32) + bi_ref[l]
        # TODO(synk): HF RoBERTa uses exact (erf) GELU; tanh approximation used here.
        h1 = jax.nn.gelu(h1, approximate=True)
        h2 = jnp.dot(h1, wp_ref[l], preferred_element_type=jnp.float32) + bp_ref[l]
        x = _layer_norm(h2 + y, ln_ref[ln_base + 2], ln_ref[ln_base + 3])

    # ---- span head: cat(last, prev) @ W  ==  last @ W[:H] + prev @ W[H:]
    # TODO(synk): nn.Dropout(0.2) is stochastic; treated as inference-mode identity.
    logits = (jnp.dot(x, whead_ref[0], preferred_element_type=jnp.float32)
              + jnp.dot(h_prev, whead_ref[1], preferred_element_type=jnp.float32)
              + bhead_ref[...])
    out_ref[...] = logits.astype(out_ref.dtype)


# ----------------------------- parameters -----------------------------------

def init_params(key):
    std = 0.02
    ks = jax.random.split(key, 3 + N_LAYERS + 1)
    params = {
        "word_emb": std * jax.random.normal(ks[0], (VOCAB, HIDDEN), jnp.float32),
        "pos_emb": std * jax.random.normal(ks[1], (MAX_POS, HIDDEN), jnp.float32),
        "type_emb": std * jax.random.normal(ks[2], (TYPE_VOCAB, HIDDEN), jnp.float32),
        "emb_ln_g": jnp.ones((1, HIDDEN), jnp.float32),
        "emb_ln_b": jnp.zeros((1, HIDDEN), jnp.float32),
    }
    layers = []
    for i in range(N_LAYERS):
        lk = jax.random.split(ks[3 + i], 6)
        layers.append({
            "wq": std * jax.random.normal(lk[0], (HIDDEN, HIDDEN), jnp.float32),
            "bq": jnp.zeros((1, HIDDEN), jnp.float32),
            "wk": std * jax.random.normal(lk[1], (HIDDEN, HIDDEN), jnp.float32),
            "bk": jnp.zeros((1, HIDDEN), jnp.float32),
            "wv": std * jax.random.normal(lk[2], (HIDDEN, HIDDEN), jnp.float32),
            "bv": jnp.zeros((1, HIDDEN), jnp.float32),
            "wo": std * jax.random.normal(lk[3], (HIDDEN, HIDDEN), jnp.float32),
            "bo": jnp.zeros((1, HIDDEN), jnp.float32),
            "ln1g": jnp.ones((1, HIDDEN), jnp.float32),
            "ln1b": jnp.zeros((1, HIDDEN), jnp.float32),
            "wi": std * jax.random.normal(lk[4], (HIDDEN, INTERMEDIATE), jnp.float32),
            "bi": jnp.zeros((1, INTERMEDIATE), jnp.float32),
            "wp": std * jax.random.normal(lk[5], (INTERMEDIATE, HIDDEN), jnp.float32),
            "bp": jnp.zeros((1, HIDDEN), jnp.float32),
            "ln2g": jnp.ones((1, HIDDEN), jnp.float32),
            "ln2b": jnp.zeros((1, HIDDEN), jnp.float32),
        })
    params["layers"] = layers
    # self.l0 = nn.Linear(2H, 2), weight init normal(std=0.02); dedicated key
    # (previous version reused a layer key).
    params["head_w"] = std * jax.random.normal(ks[3 + N_LAYERS],
                                               (2 * HIDDEN, 2), jnp.float32)
    params["head_b"] = jnp.zeros((2,), jnp.float32)
    return params


def pack_params(params):
    """Pack per-layer weights into the stacked layout the fused kernel expects."""
    wqkv, bqkv, wo, bo, wi, bi, wp, bp = [], [], [], [], [], [], [], []
    ln = [params["emb_ln_g"], params["emb_ln_b"]]
    for lp in params["layers"]:
        for wname, bname in (("wq", "bq"), ("wk", "bk"), ("wv", "bv")):
            for h in range(N_HEADS):
                cols = slice(h * HEAD_DIM, (h + 1) * HEAD_DIM)
                wqkv.append(lp[wname][:, cols])          # (H, HD)
                bqkv.append(lp[bname][:, cols])          # (1, HD)
        for h in range(N_HEADS):
            wo.append(lp["wo"][h * HEAD_DIM:(h + 1) * HEAD_DIM, :])   # (HD, H)
        bo.append(lp["bo"])
        wi.append(lp["wi"]); bi.append(lp["bi"])
        wp.append(lp["wp"]); bp.append(lp["bp"])
        ln += [lp["ln1g"], lp["ln1b"], lp["ln2g"], lp["ln2b"]]
    # Span head: split the (2H, 2) weight into (h_last, h_prev) halves and pad
    # the output dim to 128 lanes so the kernel's final store is unmasked.
    whead = jnp.zeros((2, HIDDEN, HEAD_PAD), jnp.float32)
    whead = whead.at[0, :, :2].set(params["head_w"][:HIDDEN])
    whead = whead.at[1, :, :2].set(params["head_w"][HIDDEN:])
    bhead = jnp.zeros((1, HEAD_PAD), jnp.float32).at[0, :2].set(params["head_b"])
    return {
        "wqkv": jnp.stack(wqkv), "bqkv": jnp.stack(bqkv),
        "wo": jnp.stack(wo), "bo": jnp.stack(bo),
        "wi": jnp.stack(wi), "bi": jnp.stack(bi),
        "wp": jnp.stack(wp), "bp": jnp.stack(bp),
        "ln": jnp.stack(ln),
        "whead": whead, "bhead": bhead,
    }


# ----------------------------- forward ---------------------------------------

@jax.jit
def tweet_model_forward(params, packed, ids, mask, token_type_ids):
    B, S = ids.shape
    maskf = mask.astype(jnp.float32)
    # RoBERTa-style position ids (padding_idx = 1); fine while S << MAX_POS.
    pos_ids = (jnp.cumsum(mask, axis=1) * mask + 1).astype(jnp.int32)
    emb = (params["word_emb"][ids]
           + params["pos_emb"][pos_ids]
           + params["type_emb"][token_type_ids])
    emb_flat = emb.reshape(B * S, HIDDEN)                # (B*S, H)
    add_mask = ((1.0 - maskf) * -10000.0)[:, None, :]    # (B, 1, S)

    # Single fused pallas_call, grid=(): everything (a few KB) lives in VMEM.
    out = pl.pallas_call(
        tweet_fwd_kernel,
        out_shape=jax.ShapeDtypeStruct((B * S, HEAD_PAD), jnp.float32),
    )(emb_flat, add_mask,
      packed["wqkv"], packed["bqkv"], packed["wo"], packed["bo"],
      packed["wi"], packed["bi"], packed["wp"], packed["bp"],
      packed["ln"], packed["whead"], packed["bhead"])

    start_logits = out[:, 0].reshape(B, S)
    end_logits = out[:, 1].reshape(B, S)
    return start_logits, end_logits


if __name__ == "__main__":
    key = jax.random.PRNGKey(0)
    pkey, dkey = jax.random.split(key)
    params = init_params(pkey)
    packed = pack_params(params)

    B, S = 2, 8
    ids = jax.random.randint(dkey, (B, S), 2, VOCAB, dtype=jnp.int32)
    mask = jnp.ones((B, S), jnp.int32).at[1, 6:].set(0)
    token_type_ids = jnp.zeros((B, S), jnp.int32)

    start_logits, end_logits = tweet_model_forward(params, packed, ids, mask,
                                                   token_type_ids)
    jax.block_until_ready((start_logits, end_logits))
    assert start_logits.shape == (B, S) and end_logits.shape == (B, S)
    assert bool(jnp.all(jnp.isfinite(start_logits))) and bool(jnp.all(jnp.isfinite(end_logits)))
    print("KERNEL_OK")
</pallas_src>

<mosaic_0001>
module attributes {stable_mosaic.version = 11 : i64} {
  func.func @tweet_fwd_kernel(%arg0: memref<16x32xf32, #tpu.memory_space<vmem>>, %arg1: memref<2x1x8xf32, #tpu.memory_space<vmem>>, %arg2: memref<12x32x16xf32, #tpu.memory_space<vmem>>, %arg3: memref<12x1x16xf32, #tpu.memory_space<vmem>>, %arg4: memref<4x16x32xf32, #tpu.memory_space<vmem>>, %arg5: memref<2x1x32xf32, #tpu.memory_space<vmem>>, %arg6: memref<2x32x64xf32, #tpu.memory_space<vmem>>, %arg7: memref<2x1x64xf32, #tpu.memory_space<vmem>>, %arg8: memref<2x64x32xf32, #tpu.memory_space<vmem>>, %arg9: memref<2x1x32xf32, #tpu.memory_space<vmem>>, %arg10: memref<10x1x32xf32, #tpu.memory_space<vmem>>, %arg11: memref<2x32x128xf32, #tpu.memory_space<vmem>>, %arg12: memref<1x128xf32, #tpu.memory_space<vmem>>, %arg13: memref<16x128xf32, #tpu.memory_space<vmem>>) attributes {dimension_semantics = [], scalar_prefetch = 0 : i64, scratch_operands = 0 : i64, tpu.core_type = #tpu.core_type<tc>} {
    %c0 = arith.constant 0 : index
    %c0_0 = arith.constant 0 : index
    %0 = vector.load %arg0[%c0, %c0_0] : memref<16x32xf32, #tpu.memory_space<vmem>>, vector<16x32xf32>
    %c0_1 = arith.constant 0 : index
    %c0_2 = arith.constant 0 : index
    %c0_3 = arith.constant 0 : index
    %1 = vector.load %arg10[%c0_1, %c0_2, %c0_3] : memref<10x1x32xf32, #tpu.memory_space<vmem>>, vector<1x1x32xf32>
    %2 = vector.shape_cast %1 : vector<1x1x32xf32> to vector<1x32xf32>
    %c1 = arith.constant 1 : index
    %c0_4 = arith.constant 0 : index
    %c0_5 = arith.constant 0 : index
    %3 = vector.load %arg10[%c1, %c0_4, %c0_5] : memref<10x1x32xf32, #tpu.memory_space<vmem>>, vector<1x1x32xf32>
    %4 = vector.shape_cast %3 : vector<1x1x32xf32> to vector<1x32xf32>
    %cst = arith.constant dense<0.000000e+00> : vector<16xf32>
    %5 = vector.multi_reduction <add>, %0, %cst [1] : vector<16x32xf32> to vector<16xf32>
    %6 = vector.shape_cast %5 : vector<16xf32> to vector<16x1xf32>
    %cst_6 = arith.constant 3.200000e+01 : f32
    %7 = vector.broadcast %cst_6 : f32 to vector<16x1xf32>
    %8 = arith.divf %6, %7 : vector<16x1xf32>
    %9 = vector.broadcast %8 : vector<16x1xf32> to vector<16x32xf32>
    %10 = arith.subf %0, %9 : vector<16x32xf32>
    %11 = arith.mulf %10, %10 : vector<16x32xf32>
    %cst_7 = arith.constant dense<0.000000e+00> : vector<16xf32>
    %12 = vector.multi_reduction <add>, %11, %cst_7 [1] : vector<16x32xf32> to vector<16xf32>
    %13 = vector.shape_cast %12 : vector<16xf32> to vector<16x1xf32>
    %cst_8 = arith.constant 3.200000e+01 : f32
    %14 = vector.broadcast %cst_8 : f32 to vector<16x1xf32>
    %15 = arith.divf %13, %14 : vector<16x1xf32>
    %16 = vector.broadcast %8 : vector<16x1xf32> to vector<16x32xf32>
    %17 = arith.subf %0, %16 : vector<16x32xf32>
    %cst_9 = arith.constant 9.99999974E-6 : f32
    %18 = vector.broadcast %cst_9 : f32 to vector<16x1xf32>
    %19 = arith.addf %15, %18 : vector<16x1xf32>
    %20 = math.rsqrt %19 : vector<16x1xf32>
    %21 = vector.broadcast %20 : vector<16x1xf32> to vector<16x32xf32>
    %22 = arith.mulf %17, %21 : vector<16x32xf32>
    %23 = vector.broadcast %2 : vector<1x32xf32> to vector<16x32xf32>
    %24 = arith.mulf %22, %23 : vector<16x32xf32>
    %25 = vector.broadcast %4 : vector<1x32xf32> to vector<16x32xf32>
    %26 = arith.addf %24, %25 : vector<16x32xf32>
    %cst_10 = arith.constant 0.000000e+00 : f32
    %27 = vector.broadcast %cst_10 : f32 to vector<16x32xf32>
    %c0_11 = arith.constant 0 : index
    %c0_12 = arith.constant 0 : index
    %c0_13 = arith.constant 0 : index
    %28 = vector.load %arg2[%c0_11, %c0_12, %c0_13] : memref<12x32x16xf32, #tpu.memory_space<vmem>>, vector<1x32x16xf32>
    %29 = vector.shape_cast %28 : vector<1x32x16xf32> to vector<32x16xf32>
    %cst_14 = arith.constant dense<0.000000e+00> : vector<16x16xf32>
    %30 = tpu.matmul %26, %29, %cst_14 {dimension_numbers = #tpu.dot_dimension_numbers<[1], [0], [0], [1], [0, 0, 1, 1], [], []>} : vector<16x32xf32>, vector<32x16xf32>, vector<16x16xf32> -> vector<16x16xf32>
    %c0_15 = arith.constant 0 : index
    %c0_16 = arith.constant 0 : index
    %c0_17 = arith.constant 0 : index
    %31 = vector.load %arg3[%c0_15, %c0_16, %c0_17] : memref<12x1x16xf32, #tpu.memory_space<vmem>>, vector<1x1x16xf32>
    %32 = vector.shape_cast %31 : vector<1x1x16xf32> to vector<1x16xf32>
    %33 = vector.broadcast %32 : vector<1x16xf32> to vector<16x16xf32>
    %34 = arith.addf %30, %33 : vector<16x16xf32>
    %c2 = arith.constant 2 : index
    %c0_18 = arith.constant 0 : index
    %c0_19 = arith.constant 0 : index
    %35 = vector.load %arg2[%c2, %c0_18, %c0_19] : memref<12x32x16xf32, #tpu.memory_space<vmem>>, vector<1x32x16xf32>
    %36 = vector.shape_cast %35 : vector<1x32x16xf32> to vector<32x16xf32>
    %cst_20 = arith.constant dense<0.000000e+00> : vector<16x16xf32>
    %37 = tpu.matmul %26, %36, %cst_20 {dimension_numbers = #tpu.dot_dimension_numbers<[1], [0], [0], [1], [0, 0, 1, 1], [], []>} : vector<16x32xf32>, vector<32x16xf32>, vector<16x16xf32> -> vector<16x16xf32>
    %c2_21 = arith.constant 2 : index
    %c0_22 = arith.constant 0 : index
    %c0_23 = arith.constant 0 : index
    %38 = vector.load %arg3[%c2_21, %c0_22, %c0_23] : memref<12x1x16xf32, #tpu.memory_space<vmem>>, vector<1x1x16xf32>
    %39 = vector.shape_cast %38 : vector<1x1x16xf32> to vector<1x16xf32>
    %40 = vector.broadcast %39 : vector<1x16xf32> to vector<16x16xf32>
    %41 = arith.addf %37, %40 : vector<16x16xf32>
    %c4 = arith.constant 4 : index
    %c0_24 = arith.constant 0 : index
    %c0_25 = arith.constant 0 : index
    %42 = vector.load %arg2[%c4, %c0_24, %c0_25] : memref<12x32x16xf32, #tpu.memory_space<vmem>>, vector<1x32x16xf32>
    %43 = vector.shape_cast %42 : vector<1x32x16xf32> to vector<32x16xf32>
    %cst_26 = arith.constant dense<0.000000e+00> : vector<16x16xf32>
    %44 = tpu.matmul %26, %43, %cst_26 {dimension_numbers = #tpu.dot_dimension_numbers<[1], [0], [0], [1], [0, 0, 1, 1], [], []>} : vector<16x32xf32>, vector<32x16xf32>, vector<16x16xf32> -> vector<16x16xf32>
    %c4_27 = arith.constant 4 : index
    %c0_28 = arith.constant 0 : index
    %c0_29 = arith.constant 0 : index
    %45 = vector.load %arg3[%c4_27, %c0_28, %c0_29] : memref<12x1x16xf32, #tpu.memory_space<vmem>>, vector<1x1x16xf32>
    %46 = vector.shape_cast %45 : vector<1x1x16xf32> to vector<1x16xf32>
    %47 = vector.broadcast %46 : vector<1x16xf32> to vector<16x16xf32>
    %48 = arith.addf %44, %47 : vector<16x16xf32>
    %49 = vector.extract_strided_slice %34 {offsets = [0, 0], sizes = [8, 16], strides = [1, 1]} : vector<16x16xf32> to vector<8x16xf32>
    %50 = vector.extract_strided_slice %41 {offsets = [0, 0], sizes = [8, 16], strides = [1, 1]} : vector<16x16xf32> to vector<8x16xf32>
    %51 = vector.extract_strided_slice %48 {offsets = [0, 0], sizes = [8, 16], strides = [1, 1]} : vector<16x16xf32> to vector<8x16xf32>
    %52 = tpu.transpose %50, [1, 0] : vector<8x16xf32> -> vector<16x8xf32>
    %cst_30 = arith.constant dense<0.000000e+00> : vector<8x8xf32>
    %53 = tpu.matmul %49, %52, %cst_30 {dimension_numbers = #tpu.dot_dimension_numbers<[1], [0], [0], [1], [0, 0, 1, 1], [], []>} : vector<8x16xf32>, vector<16x8xf32>, vector<8x8xf32> -> vector<8x8xf32>
    %cst_31 = arith.constant 2.500000e-01 : f32
    %54 = vector.broadcast %cst_31 : f32 to vector<8x8xf32>
    %55 = arith.mulf %53, %54 : vector<8x8xf32>
    %c0_32 = arith.constant 0 : index
    %c0_33 = arith.constant 0 : index
    %c0_34 = arith.constant 0 : index
    %56 = vector.load %arg1[%c0_32, %c0_33, %c0_34] : memref<2x1x8xf32, #tpu.memory_space<vmem>>, vector<1x1x8xf32>
    %57 = vector.shape_cast %56 : vector<1x1x8xf32> to vector<1x8xf32>
    %58 = vector.broadcast %57 : vector<1x8xf32> to vector<8x8xf32>
    %59 = arith.addf %55, %58 : vector<8x8xf32>
    %cst_35 = arith.constant dense<0xFF800000> : vector<8xf32>
    %60 = vector.multi_reduction <maximumf>, %59, %cst_35 [1] : vector<8x8xf32> to vector<8xf32>
    %61 = vector.shape_cast %60 : vector<8xf32> to vector<8x1xf32>
    %62 = vector.broadcast %61 : vector<8x1xf32> to vector<8x8xf32>
    %63 = arith.subf %59, %62 : vector<8x8xf32>
    %64 = math.exp %63 : vector<8x8xf32>
    %cst_36 = arith.constant dense<0.000000e+00> : vector<8xf32>
    %65 = vector.multi_reduction <add>, %64, %cst_36 [1] : vector<8x8xf32> to vector<8xf32>
    %66 = vector.shape_cast %65 : vector<8xf32> to vector<8x1xf32>
    %67 = tpu.reciprocal %66 {approx = true} : vector<8x1xf32> -> vector<8x1xf32>
    %68 = vector.broadcast %67 : vector<8x1xf32> to vector<8x8xf32>
    %69 = arith.mulf %64, %68 : vector<8x8xf32>
    %cst_37 = arith.constant dense<0.000000e+00> : vector<8x16xf32>
    %70 = tpu.matmul %69, %51, %cst_37 {dimension_numbers = #tpu.dot_dimension_numbers<[1], [0], [0], [1], [0, 0, 1, 1], [], []>} : vector<8x8xf32>, vector<8x16xf32>, vector<8x16xf32> -> vector<8x16xf32>
    %71 = vector.extract_strided_slice %34 {offsets = [8, 0], sizes = [8, 16], strides = [1, 1]} : vector<16x16xf32> to vector<8x16xf32>
    %72 = vector.extract_strided_slice %41 {offsets = [8, 0], sizes = [8, 16], strides = [1, 1]} : vector<16x16xf32> to vector<8x16xf32>
    %73 = vector.extract_strided_slice %48 {offsets = [8, 0], sizes = [8, 16], strides = [1, 1]} : vector<16x16xf32> to vector<8x16xf32>
    %74 = tpu.transpose %72, [1, 0] : vector<8x16xf32> -> vector<16x8xf32>
    %cst_38 = arith.constant dense<0.000000e+00> : vector<8x8xf32>
    %75 = tpu.matmul %71, %74, %cst_38 {dimension_numbers = #tpu.dot_dimension_numbers<[1], [0], [0], [1], [0, 0, 1, 1], [], []>} : vector<8x16xf32>, vector<16x8xf32>, vector<8x8xf32> -> vector<8x8xf32>
    %cst_39 = arith.constant 2.500000e-01 : f32
    %76 = vector.broadcast %cst_39 : f32 to vector<8x8xf32>
    %77 = arith.mulf %75, %76 : vector<8x8xf32>
    %c1_40 = arith.constant 1 : index
    %c0_41 = arith.constant 0 : index
    %c0_42 = arith.constant 0 : index
    %78 = vector.load %arg1[%c1_40, %c0_41, %c0_42] : memref<2x1x8xf32, #tpu.memory_space<vmem>>, vector<1x1x8xf32>
    %79 = vector.shape_cast %78 : vector<1x1x8xf32> to vector<1x8xf32>
    %80 = vector.broadcast %79 : vector<1x8xf32> to vector<8x8xf32>
    %81 = arith.addf %77, %80 : vector<8x8xf32>
    %cst_43 = arith.constant dense<0xFF800000> : vector<8xf32>
    %82 = vector.multi_reduction <maximumf>, %81, %cst_43 [1] : vector<8x8xf32> to vector<8xf32>
    %83 = vector.shape_cast %82 : vector<8xf32> to vector<8x1xf32>
    %84 = vector.broadcast %83 : vector<8x1xf32> to vector<8x8xf32>
    %85 = arith.subf %81, %84 : vector<8x8xf32>
    %86 = math.exp %85 : vector<8x8xf32>
    %cst_44 = arith.constant dense<0.000000e+00> : vector<8xf32>
    %87 = vector.multi_reduction <add>, %86, %cst_44 [1] : vector<8x8xf32> to vector<8xf32>
    %88 = vector.shape_cast %87 : vector<8xf32> to vector<8x1xf32>
    %89 = tpu.reciprocal %88 {approx = true} : vector<8x1xf32> -> vector<8x1xf32>
    %90 = vector.broadcast %89 : vector<8x1xf32> to vector<8x8xf32>
    %91 = arith.mulf %86, %90 : vector<8x8xf32>
    %cst_45 = arith.constant dense<0.000000e+00> : vector<8x16xf32>
    %92 = tpu.matmul %91, %73, %cst_45 {dimension_numbers = #tpu.dot_dimension_numbers<[1], [0], [0], [1], [0, 0, 1, 1], [], []>} : vector<8x8xf32>, vector<8x16xf32>, vector<8x16xf32> -> vector<8x16xf32>
    %93 = tpu.concatenate %70, %92 in 0 : vector<8x16xf32>, vector<8x16xf32> -> vector<16x16xf32>
    %c0_46 = arith.constant 0 : index
    %c0_47 = arith.constant 0 : index
    %c0_48 = arith.constant 0 : index
    %94 = vector.load %arg4[%c0_46, %c0_47, %c0_48] : memref<4x16x32xf32, #tpu.memory_space<vmem>>, vector<1x16x32xf32>
    %95 = vector.shape_cast %94 : vector<1x16x32xf32> to vector<16x32xf32>
    %cst_49 = arith.constant dense<0.000000e+00> : vector<16x32xf32>
    %96 = tpu.matmul %93, %95, %cst_49 {dimension_numbers = #tpu.dot_dimension_numbers<[1], [0], [0], [1], [0, 0, 1, 1], [], []>} : vector<16x16xf32>, vector<16x32xf32>, vector<16x32xf32> -> vector<16x32xf32>
    %97 = arith.addf %27, %96 : vector<16x32xf32>
    %c1_50 = arith.constant 1 : index
    %c0_51 = arith.constant 0 : index
    %c0_52 = arith.constant 0 : index
    %98 = vector.load %arg2[%c1_50, %c0_51, %c0_52] : memref<12x32x16xf32, #tpu.memory_space<vmem>>, vector<1x32x16xf32>
    %99 = vector.shape_cast %98 : vector<1x32x16xf32> to vector<32x16xf32>
    %cst_53 = arith.constant dense<0.000000e+00> : vector<16x16xf32>
    %100 = tpu.matmul %26, %99, %cst_53 {dimension_numbers = #tpu.dot_dimension_numbers<[1], [0], [0], [1], [0, 0, 1, 1], [], []>} : vector<16x32xf32>, vector<32x16xf32>, vector<16x16xf32> -> vector<16x16xf32>
    %c1_54 = arith.constant 1 : index
    %c0_55 = arith.constant 0 : index
    %c0_56 = arith.constant 0 : index
    %101 = vector.load %arg3[%c1_54, %c0_55, %c0_56] : memref<12x1x16xf32, #tpu.memory_space<vmem>>, vector<1x1x16xf32>
    %102 = vector.shape_cast %101 : vector<1x1x16xf32> to vector<1x16xf32>
    %103 = vector.broadcast %102 : vector<1x16xf32> to vector<16x16xf32>
    %104 = arith.addf %100, %103 : vector<16x16xf32>
    %c3 = arith.constant 3 : index
    %c0_57 = arith.constant 0 : index
    %c0_58 = arith.constant 0 : index
    %105 = vector.load %arg2[%c3, %c0_57, %c0_58] : memref<12x32x16xf32, #tpu.memory_space<vmem>>, vector<1x32x16xf32>
    %106 = vector.shape_cast %105 : vector<1x32x16xf32> to vector<32x16xf32>
    %cst_59 = arith.constant dense<0.000000e+00> : vector<16x16xf32>
    %107 = tpu.matmul %26, %106, %cst_59 {dimension_numbers = #tpu.dot_dimension_numbers<[1], [0], [0], [1], [0, 0, 1, 1], [], []>} : vector<16x32xf32>, vector<32x16xf32>, vector<16x16xf32> -> vector<16x16xf32>
    %c3_60 = arith.constant 3 : index
    %c0_61 = arith.constant 0 : index
    %c0_62 = arith.constant 0 : index
    %108 = vector.load %arg3[%c3_60, %c0_61, %c0_62] : memref<12x1x16xf32, #tpu.memory_space<vmem>>, vector<1x1x16xf32>
    %109 = vector.shape_cast %108 : vector<1x1x16xf32> to vector<1x16xf32>
    %110 = vector.broadcast %109 : vector<1x16xf32> to vector<16x16xf32>
    %111 = arith.addf %107, %110 : vector<16x16xf32>
    %c5 = arith.constant 5 : index
    %c0_63 = arith.constant 0 : index
    %c0_64 = arith.constant 0 : index
    %112 = vector.load %arg2[%c5, %c0_63, %c0_64] : memref<12x32x16xf32, #tpu.memory_space<vmem>>, vector<1x32x16xf32>
    %113 = vector.shape_cast %112 : vector<1x32x16xf32> to vector<32x16xf32>
    %cst_65 = arith.constant dense<0.000000e+00> : vector<16x16xf32>
    %114 = tpu.matmul %26, %113, %cst_65 {dimension_numbers = #tpu.dot_dimension_numbers<[1], [0], [0], [1], [0, 0, 1, 1], [], []>} : vector<16x32xf32>, vector<32x16xf32>, vector<16x16xf32> -> vector<16x16xf32>
    %c5_66 = arith.constant 5 : index
    %c0_67 = arith.constant 0 : index
    %c0_68 = arith.constant 0 : index
    %115 = vector.load %arg3[%c5_66, %c0_67, %c0_68] : memref<12x1x16xf32, #tpu.memory_space<vmem>>, vector<1x1x16xf32>
    %116 = vector.shape_cast %115 : vector<1x1x16xf32> to vector<1x16xf32>
    %117 = vector.broadcast %116 : vector<1x16xf32> to vector<16x16xf32>
    %118 = arith.addf %114, %117 : vector<16x16xf32>
    %119 = vector.extract_strided_slice %104 {offsets = [0, 0], sizes = [8, 16], strides = [1, 1]} : vector<16x16xf32> to vector<8x16xf32>
    %120 = vector.extract_strided_slice %111 {offsets = [0, 0], sizes = [8, 16], strides = [1, 1]} : vector<16x16xf32> to vector<8x16xf32>
    %121 = vector.extract_strided_slice %118 {offsets = [0, 0], sizes = [8, 16], strides = [1, 1]} : vector<16x16xf32> to vector<8x16xf32>
    %122 = tpu.transpose %120, [1, 0] : vector<8x16xf32> -> vector<16x8xf32>
    %cst_69 = arith.constant dense<0.000000e+00> : vector<8x8xf32>
    %123 = tpu.matmul %119, %122, %cst_69 {dimension_numbers = #tpu.dot_dimension_numbers<[1], [0], [0], [1], [0, 0, 1, 1], [], []>} : vector<8x16xf32>, vector<16x8xf32>, vector<8x8xf32> -> vector<8x8xf32>
    %cst_70 = arith.constant 2.500000e-01 : f32
    %124 = vector.broadcast %cst_70 : f32 to vector<8x8xf32>
    %125 = arith.mulf %123, %124 : vector<8x8xf32>
    %c0_71 = arith.constant 0 : index
    %c0_72 = arith.constant 0 : index
    %c0_73 = arith.constant 0 : index
    %126 = vector.load %arg1[%c0_71, %c0_72, %c0_73] : memref<2x1x8xf32, #tpu.memory_space<vmem>>, vector<1x1x8xf32>
    %127 = vector.shape_cast %126 : vector<1x1x8xf32> to vector<1x8xf32>
    %128 = vector.broadcast %127 : vector<1x8xf32> to vector<8x8xf32>
    %129 = arith.addf %125, %128 : vector<8x8xf32>
    %cst_74 = arith.constant dense<0xFF800000> : vector<8xf32>
    %130 = vector.multi_reduction <maximumf>, %129, %cst_74 [1] : vector<8x8xf32> to vector<8xf32>
    %131 = vector.shape_cast %130 : vector<8xf32> to vector<8x1xf32>
    %132 = vector.broadcast %131 : vector<8x1xf32> to vector<8x8xf32>
    %133 = arith.subf %129, %132 : vector<8x8xf32>
    %134 = math.exp %133 : vector<8x8xf32>
    %cst_75 = arith.constant dense<0.000000e+00> : vector<8xf32>
    %135 = vector.multi_reduction <add>, %134, %cst_75 [1] : vector<8x8xf32> to vector<8xf32>
    %136 = vector.shape_cast %135 : vector<8xf32> to vector<8x1xf32>
    %137 = tpu.reciprocal %136 {approx = true} : vector<8x1xf32> -> vector<8x1xf32>
    %138 = vector.broadcast %137 : vector<8x1xf32> to vector<8x8xf32>
    %139 = arith.mulf %134, %138 : vector<8x8xf32>
    %cst_76 = arith.constant dense<0.000000e+00> : vector<8x16xf32>
    %140 = tpu.matmul %139, %121, %cst_76 {dimension_numbers = #tpu.dot_dimension_numbers<[1], [0], [0], [1], [0, 0, 1, 1], [], []>} : vector<8x8xf32>, vector<8x16xf32>, vector<8x16xf32> -> vector<8x16xf32>
    %141 = vector.extract_strided_slice %104 {offsets = [8, 0], sizes = [8, 16], strides = [1, 1]} : vector<16x16xf32> to vector<8x16xf32>
    %142 = vector.extract_strided_slice %111 {offsets = [8, 0], sizes = [8, 16], strides = [1, 1]} : vector<16x16xf32> to vector<8x16xf32>
    %143 = vector.extract_strided_slice %118 {offsets = [8, 0], sizes = [8, 16], strides = [1, 1]} : vector<16x16xf32> to vector<8x16xf32>
    %144 = tpu.transpose %142, [1, 0] : vector<8x16xf32> -> vector<16x8xf32>
    %cst_77 = arith.constant dense<0.000000e+00> : vector<8x8xf32>
    %145 = tpu.matmul %141, %144, %cst_77 {dimension_numbers = #tpu.dot_dimension_numbers<[1], [0], [0], [1], [0, 0, 1, 1], [], []>} : vector<8x16xf32>, vector<16x8xf32>, vector<8x8xf32> -> vector<8x8xf32>
    %cst_78 = arith.constant 2.500000e-01 : f32
    %146 = vector.broadcast %cst_78 : f32 to vector<8x8xf32>
    %147 = arith.mulf %145, %146 : vector<8x8xf32>
    %c1_79 = arith.constant 1 : index
    %c0_80 = arith.constant 0 : index
    %c0_81 = arith.constant 0 : index
    %148 = vector.load %arg1[%c1_79, %c0_80, %c0_81] : memref<2x1x8xf32, #tpu.memory_space<vmem>>, vector<1x1x8xf32>
    %149 = vector.shape_cast %148 : vector<1x1x8xf32> to vector<1x8xf32>
    %150 = vector.broadcast %149 : vector<1x8xf32> to vector<8x8xf32>
    %151 = arith.addf %147, %150 : vector<8x8xf32>
    %cst_82 = arith.constant dense<0xFF800000> : vector<8xf32>
    %152 = vector.multi_reduction <maximumf>, %151, %cst_82 [1] : vector<8x8xf32> to vector<8xf32>
    %153 = vector.shape_cast %152 : vector<8xf32> to vector<8x1xf32>
    %154 = vector.broadcast %153 : vector<8x1xf32> to vector<8x8xf32>
    %155 = arith.subf %151, %154 : vector<8x8xf32>
    %156 = math.exp %155 : vector<8x8xf32>
    %cst_83 = arith.constant dense<0.000000e+00> : vector<8xf32>
    %157 = vector.multi_reduction <add>, %156, %cst_83 [1] : vector<8x8xf32> to vector<8xf32>
    %158 = vector.shape_cast %157 : vector<8xf32> to vector<8x1xf32>
    %159 = tpu.reciprocal %158 {approx = true} : vector<8x1xf32> -> vector<8x1xf32>
    %160 = vector.broadcast %159 : vector<8x1xf32> to vector<8x8xf32>
    %161 = arith.mulf %156, %160 : vector<8x8xf32>
    %cst_84 = arith.constant dense<0.000000e+00> : vector<8x16xf32>
    %162 = tpu.matmul %161, %143, %cst_84 {dimension_numbers = #tpu.dot_dimension_numbers<[1], [0], [0], [1], [0, 0, 1, 1], [], []>} : vector<8x8xf32>, vector<8x16xf32>, vector<8x16xf32> -> vector<8x16xf32>
    %163 = tpu.concatenate %140, %162 in 0 : vector<8x16xf32>, vector<8x16xf32> -> vector<16x16xf32>
    %c1_85 = arith.constant 1 : index
    %c0_86 = arith.constant 0 : index
    %c0_87 = arith.constant 0 : index
    %164 = vector.load %arg4[%c1_85, %c0_86, %c0_87] : memref<4x16x32xf32, #tpu.memory_space<vmem>>, vector<1x16x32xf32>
    %165 = vector.shape_cast %164 : vector<1x16x32xf32> to vector<16x32xf32>
    %cst_88 = arith.constant dense<0.000000e+00> : vector<16x32xf32>
    %166 = tpu.matmul %163, %165, %cst_88 {dimension_numbers = #tpu.dot_dimension_numbers<[1], [0], [0], [1], [0, 0, 1, 1], [], []>} : vector<16x16xf32>, vector<16x32xf32>, vector<16x32xf32> -> vector<16x32xf32>
    %167 = arith.addf %97, %166 : vector<16x32xf32>
    %c0_89 = arith.constant 0 : index
    %c0_90 = arith.constant 0 : index
    %c0_91 = arith.constant 0 : index
    %168 = vector.load %arg5[%c0_89, %c0_90, %c0_91] : memref<2x1x32xf32, #tpu.memory_space<vmem>>, vector<1x1x32xf32>
    %169 = vector.shape_cast %168 : vector<1x1x32xf32> to vector<1x32xf32>
    %170 = vector.broadcast %169 : vector<1x32xf32> to vector<16x32xf32>
    %171 = arith.addf %167, %170 : vector<16x32xf32>
    %172 = arith.addf %171, %26 : vector<16x32xf32>
    %c2_92 = arith.constant 2 : index
    %c0_93 = arith.constant 0 : index
    %c0_94 = arith.constant 0 : index
    %173 = vector.load %arg10[%c2_92, %c0_93, %c0_94] : memref<10x1x32xf32, #tpu.memory_space<vmem>>, vector<1x1x32xf32>
    %174 = vector.shape_cast %173 : vector<1x1x32xf32> to vector<1x32xf32>
    %c3_95 = arith.constant 3 : index
    %c0_96 = arith.constant 0 : index
    %c0_97 = arith.constant 0 : index
    %175 = vector.load %arg10[%c3_95, %c0_96, %c0_97] : memref<10x1x32xf32, #tpu.memory_space<vmem>>, vector<1x1x32xf32>
    %176 = vector.shape_cast %175 : vector<1x1x32xf32> to vector<1x32xf32>
    %cst_98 = arith.constant dense<0.000000e+00> : vector<16xf32>
    %177 = vector.multi_reduction <add>, %172, %cst_98 [1] : vector<16x32xf32> to vector<16xf32>
    %178 = vector.shape_cast %177 : vector<16xf32> to vector<16x1xf32>
    %cst_99 = arith.constant 3.200000e+01 : f32
    %179 = vector.broadcast %cst_99 : f32 to vector<16x1xf32>
    %180 = arith.divf %178, %179 : vector<16x1xf32>
    %181 = vector.broadcast %180 : vector<16x1xf32> to vector<16x32xf32>
    %182 = arith.subf %172, %181 : vector<16x32xf32>
    %183 = arith.mulf %182, %182 : vector<16x32xf32>
    %cst_100 = arith.constant dense<0.000000e+00> : vector<16xf32>
    %184 = vector.multi_reduction <add>, %183, %cst_100 [1] : vector<16x32xf32> to vector<16xf32>
    %185 = vector.shape_cast %184 : vector<16xf32> to vector<16x1xf32>
    %cst_101 = arith.constant 3.200000e+01 : f32
    %186 = vector.broadcast %cst_101 : f32 to vector<16x1xf32>
    %187 = arith.divf %185, %186 : vector<16x1xf32>
    %188 = vector.broadcast %180 : vector<16x1xf32> to vector<16x32xf32>
    %189 = arith.subf %172, %188 : vector<16x32xf32>
    %cst_102 = arith.constant 9.99999974E-6 : f32
    %190 = vector.broadcast %cst_102 : f32 to vector<16x1xf32>
    %191 = arith.addf %187, %190 : vector<16x1xf32>
    %192 = math.rsqrt %191 : vector<16x1xf32>
    %193 = vector.broadcast %192 : vector<16x1xf32> to vector<16x32xf32>
    %194 = arith.mulf %189, %193 : vector<16x32xf32>
    %195 = vector.broadcast %174 : vector<1x32xf32> to vector<16x32xf32>
    %196 = arith.mulf %194, %195 : vector<16x32xf32>
    %197 = vector.broadcast %176 : vector<1x32xf32> to vector<16x32xf32>
    %198 = arith.addf %196, %197 : vector<16x32xf32>
    %c0_103 = arith.constant 0 : index
    %c0_104 = arith.constant 0 : index
    %c0_105 = arith.constant 0 : index
    %199 = vector.load %arg6[%c0_103, %c0_104, %c0_105] : memref<2x32x64xf32, #tpu.memory_space<vmem>>, vector<1x32x64xf32>
    %200 = vector.shape_cast %199 : vector<1x32x64xf32> to vector<32x64xf32>
    %cst_106 = arith.constant dense<0.000000e+00> : vector<16x64xf32>
    %201 = tpu.matmul %198, %200, %cst_106 {dimension_numbers = #tpu.dot_dimension_numbers<[1], [0], [0], [1], [0, 0, 1, 1], [], []>} : vector<16x32xf32>, vector<32x64xf32>, vector<16x64xf32> -> vector<16x64xf32>
    %c0_107 = arith.constant 0 : index
    %c0_108 = arith.constant 0 : index
    %c0_109 = arith.constant 0 : index
    %202 = vector.load %arg7[%c0_107, %c0_108, %c0_109] : memref<2x1x64xf32, #tpu.memory_space<vmem>>, vector<1x1x64xf32>
    %203 = vector.shape_cast %202 : vector<1x1x64xf32> to vector<1x64xf32>
    %204 = vector.broadcast %203 : vector<1x64xf32> to vector<16x64xf32>
    %205 = arith.addf %201, %204 : vector<16x64xf32>
    %206 = arith.mulf %205, %205 : vector<16x64xf32>
    %207 = arith.mulf %205, %206 : vector<16x64xf32>
    %cst_110 = arith.constant 4.471500e-02 : f32
    %208 = vector.broadcast %cst_110 : f32 to vector<16x64xf32>
    %209 = arith.mulf %208, %207 : vector<16x64xf32>
    %210 = arith.addf %205, %209 : vector<16x64xf32>
    %cst_111 = arith.constant 0.797884583 : f32
    %211 = vector.broadcast %cst_111 : f32 to vector<16x64xf32>
    %212 = arith.mulf %211, %210 : vector<16x64xf32>
    %213 = math.tanh %212 : vector<16x64xf32>
    %cst_112 = arith.constant 1.000000e+00 : f32
    %214 = vector.broadcast %cst_112 : f32 to vector<16x64xf32>
    %215 = arith.addf %214, %213 : vector<16x64xf32>
    %cst_113 = arith.constant 5.000000e-01 : f32
    %216 = vector.broadcast %cst_113 : f32 to vector<16x64xf32>
    %217 = arith.mulf %216, %215 : vector<16x64xf32>
    %218 = arith.mulf %205, %217 : vector<16x64xf32>
    %c0_114 = arith.constant 0 : index
    %c0_115 = arith.constant 0 : index
    %c0_116 = arith.constant 0 : index
    %219 = vector.load %arg8[%c0_114, %c0_115, %c0_116] : memref<2x64x32xf32, #tpu.memory_space<vmem>>, vector<1x64x32xf32>
    %220 = vector.shape_cast %219 : vector<1x64x32xf32> to vector<64x32xf32>
    %cst_117 = arith.constant dense<0.000000e+00> : vector<16x32xf32>
    %221 = tpu.matmul %218, %220, %cst_117 {dimension_numbers = #tpu.dot_dimension_numbers<[1], [0], [0], [1], [0, 0, 1, 1], [], []>} : vector<16x64xf32>, vector<64x32xf32>, vector<16x32xf32> -> vector<16x32xf32>
    %c0_118 = arith.constant 0 : index
    %c0_119 = arith.constant 0 : index
    %c0_120 = arith.constant 0 : index
    %222 = vector.load %arg9[%c0_118, %c0_119, %c0_120] : memref<2x1x32xf32, #tpu.memory_space<vmem>>, vector<1x1x32xf32>
    %223 = vector.shape_cast %222 : vector<1x1x32xf32> to vector<1x32xf32>
    %224 = vector.broadcast %223 : vector<1x32xf32> to vector<16x32xf32>
    %225 = arith.addf %221, %224 : vector<16x32xf32>
    %226 = arith.addf %225, %198 : vector<16x32xf32>
    %c4_121 = arith.constant 4 : index
    %c0_122 = arith.constant 0 : index
    %c0_123 = arith.constant 0 : index
    %227 = vector.load %arg10[%c4_121, %c0_122, %c0_123] : memref<10x1x32xf32, #tpu.memory_space<vmem>>, vector<1x1x32xf32>
    %228 = vector.shape_cast %227 : vector<1x1x32xf32> to vector<1x32xf32>
    %c5_124 = arith.constant 5 : index
    %c0_125 = arith.constant 0 : index
    %c0_126 = arith.constant 0 : index
    %229 = vector.load %arg10[%c5_124, %c0_125, %c0_126] : memref<10x1x32xf32, #tpu.memory_space<vmem>>, vector<1x1x32xf32>
    %230 = vector.shape_cast %229 : vector<1x1x32xf32> to vector<1x32xf32>
    %cst_127 = arith.constant dense<0.000000e+00> : vector<16xf32>
    %231 = vector.multi_reduction <add>, %226, %cst_127 [1] : vector<16x32xf32> to vector<16xf32>
    %232 = vector.shape_cast %231 : vector<16xf32> to vector<16x1xf32>
    %cst_128 = arith.constant 3.200000e+01 : f32
    %233 = vector.broadcast %cst_128 : f32 to vector<16x1xf32>
    %234 = arith.divf %232, %233 : vector<16x1xf32>
    %235 = vector.broadcast %234 : vector<16x1xf32> to vector<16x32xf32>
    %236 = arith.subf %226, %235 : vector<16x32xf32>
    %237 = arith.mulf %236, %236 : vector<16x32xf32>
    %cst_129 = arith.constant dense<0.000000e+00> : vector<16xf32>
    %238 = vector.multi_reduction <add>, %237, %cst_129 [1] : vector<16x32xf32> to vector<16xf32>
    %239 = vector.shape_cast %238 : vector<16xf32> to vector<16x1xf32>
    %cst_130 = arith.constant 3.200000e+01 : f32
    %240 = vector.broadcast %cst_130 : f32 to vector<16x1xf32>
    %241 = arith.divf %239, %240 : vector<16x1xf32>
    %242 = vector.broadcast %234 : vector<16x1xf32> to vector<16x32xf32>
    %243 = arith.subf %226, %242 : vector<16x32xf32>
    %cst_131 = arith.constant 9.99999974E-6 : f32
    %244 = vector.broadcast %cst_131 : f32 to vector<16x1xf32>
    %245 = arith.addf %241, %244 : vector<16x1xf32>
    %246 = math.rsqrt %245 : vector<16x1xf32>
    %247 = vector.broadcast %246 : vector<16x1xf32> to vector<16x32xf32>
    %248 = arith.mulf %243, %247 : vector<16x32xf32>
    %249 = vector.broadcast %228 : vector<1x32xf32> to vector<16x32xf32>
    %250 = arith.mulf %248, %249 : vector<16x32xf32>
    %251 = vector.broadcast %230 : vector<1x32xf32> to vector<16x32xf32>
    %252 = arith.addf %250, %251 : vector<16x32xf32>
    %cst_132 = arith.constant 0.000000e+00 : f32
    %253 = vector.broadcast %cst_132 : f32 to vector<16x32xf32>
    %c6 = arith.constant 6 : index
    %c0_133 = arith.constant 0 : index
    %c0_134 = arith.constant 0 : index
    %254 = vector.load %arg2[%c6, %c0_133, %c0_134] : memref<12x32x16xf32, #tpu.memory_space<vmem>>, vector<1x32x16xf32>
    %255 = vector.shape_cast %254 : vector<1x32x16xf32> to vector<32x16xf32>
    %cst_135 = arith.constant dense<0.000000e+00> : vector<16x16xf32>
    %256 = tpu.matmul %252, %255, %cst_135 {dimension_numbers = #tpu.dot_dimension_numbers<[1], [0], [0], [1], [0, 0, 1, 1], [], []>} : vector<16x32xf32>, vector<32x16xf32>, vector<16x16xf32> -> vector<16x16xf32>
    %c6_136 = arith.constant 6 : index
    %c0_137 = arith.constant 0 : index
    %c0_138 = arith.constant 0 : index
    %257 = vector.load %arg3[%c6_136, %c0_137, %c0_138] : memref<12x1x16xf32, #tpu.memory_space<vmem>>, vector<1x1x16xf32>
    %258 = vector.shape_cast %257 : vector<1x1x16xf32> to vector<1x16xf32>
    %259 = vector.broadcast %258 : vector<1x16xf32> to vector<16x16xf32>
    %260 = arith.addf %256, %259 : vector<16x16xf32>
    %c8 = arith.constant 8 : index
    %c0_139 = arith.constant 0 : index
    %c0_140 = arith.constant 0 : index
    %261 = vector.load %arg2[%c8, %c0_139, %c0_140] : memref<12x32x16xf32, #tpu.memory_space<vmem>>, vector<1x32x16xf32>
    %262 = vector.shape_cast %261 : vector<1x32x16xf32> to vector<32x16xf32>
    %cst_141 = arith.constant dense<0.000000e+00> : vector<16x16xf32>
    %263 = tpu.matmul %252, %262, %cst_141 {dimension_numbers = #tpu.dot_dimension_numbers<[1], [0], [0], [1], [0, 0, 1, 1], [], []>} : vector<16x32xf32>, vector<32x16xf32>, vector<16x16xf32> -> vector<16x16xf32>
    %c8_142 = arith.constant 8 : index
    %c0_143 = arith.constant 0 : index
    %c0_144 = arith.constant 0 : index
    %264 = vector.load %arg3[%c8_142, %c0_143, %c0_144] : memref<12x1x16xf32, #tpu.memory_space<vmem>>, vector<1x1x16xf32>
    %265 = vector.shape_cast %264 : vector<1x1x16xf32> to vector<1x16xf32>
    %266 = vector.broadcast %265 : vector<1x16xf32> to vector<16x16xf32>
    %267 = arith.addf %263, %266 : vector<16x16xf32>
    %c10 = arith.constant 10 : index
    %c0_145 = arith.constant 0 : index
    %c0_146 = arith.constant 0 : index
    %268 = vector.load %arg2[%c10, %c0_145, %c0_146] : memref<12x32x16xf32, #tpu.memory_space<vmem>>, vector<1x32x16xf32>
    %269 = vector.shape_cast %268 : vector<1x32x16xf32> to vector<32x16xf32>
    %cst_147 = arith.constant dense<0.000000e+00> : vector<16x16xf32>
    %270 = tpu.matmul %252, %269, %cst_147 {dimension_numbers = #tpu.dot_dimension_numbers<[1], [0], [0], [1], [0, 0, 1, 1], [], []>} : vector<16x32xf32>, vector<32x16xf32>, vector<16x16xf32> -> vector<16x16xf32>
    %c10_148 = arith.constant 10 : index
    %c0_149 = arith.constant 0 : index
    %c0_150 = arith.constant 0 : index
    %271 = vector.load %arg3[%c10_148, %c0_149, %c0_150] : memref<12x1x16xf32, #tpu.memory_space<vmem>>, vector<1x1x16xf32>
    %272 = vector.shape_cast %271 : vector<1x1x16xf32> to vector<1x16xf32>
    %273 = vector.broadcast %272 : vector<1x16xf32> to vector<16x16xf32>
    %274 = arith.addf %270, %273 : vector<16x16xf32>
    %275 = vector.extract_strided_slice %260 {offsets = [0, 0], sizes = [8, 16], strides = [1, 1]} : vector<16x16xf32> to vector<8x16xf32>
    %276 = vector.extract_strided_slice %267 {offsets = [0, 0], sizes = [8, 16], strides = [1, 1]} : vector<16x16xf32> to vector<8x16xf32>
    %277 = vector.extract_strided_slice %274 {offsets = [0, 0], sizes = [8, 16], strides = [1, 1]} : vector<16x16xf32> to vector<8x16xf32>
    %278 = tpu.transpose %276, [1, 0] : vector<8x16xf32> -> vector<16x8xf32>
    %cst_151 = arith.constant dense<0.000000e+00> : vector<8x8xf32>
    %279 = tpu.matmul %275, %278, %cst_151 {dimension_numbers = #tpu.dot_dimension_numbers<[1], [0], [0], [1], [0, 0, 1, 1], [], []>} : vector<8x16xf32>, vector<16x8xf32>, vector<8x8xf32> -> vector<8x8xf32>
    %cst_152 = arith.constant 2.500000e-01 : f32
    %280 = vector.broadcast %cst_152 : f32 to vector<8x8xf32>
    %281 = arith.mulf %279, %280 : vector<8x8xf32>
    %c0_153 = arith.constant 0 : index
    %c0_154 = arith.constant 0 : index
    %c0_155 = arith.constant 0 : index
    %282 = vector.load %arg1[%c0_153, %c0_154, %c0_155] : memref<2x1x8xf32, #tpu.memory_space<vmem>>, vector<1x1x8xf32>
    %283 = vector.shape_cast %282 : vector<1x1x8xf32> to vector<1x8xf32>
    %284 = vector.broadcast %283 : vector<1x8xf32> to vector<8x8xf32>
    %285 = arith.addf %281, %284 : vector<8x8xf32>
    %cst_156 = arith.constant dense<0xFF800000> : vector<8xf32>
    %286 = vector.multi_reduction <maximumf>, %285, %cst_156 [1] : vector<8x8xf32> to vector<8xf32>
    %287 = vector.shape_cast %286 : vector<8xf32> to vector<8x1xf32>
    %288 = vector.broadcast %287 : vector<8x1xf32> to vector<8x8xf32>
    %289 = arith.subf %285, %288 : vector<8x8xf32>
    %290 = math.exp %289 : vector<8x8xf32>
    %cst_157 = arith.constant dense<0.000000e+00> : vector<8xf32>
    %291 = vector.multi_reduction <add>, %290, %cst_157 [1] : vector<8x8xf32> to vector<8xf32>
    %292 = vector.shape_cast %291 : vector<8xf32> to vector<8x1xf32>
    %293 = tpu.reciprocal %292 {approx = true} : vector<8x1xf32> -> vector<8x1xf32>
    %294 = vector.broadcast %293 : vector<8x1xf32> to vector<8x8xf32>
    %295 = arith.mulf %290, %294 : vector<8x8xf32>
    %cst_158 = arith.constant dense<0.000000e+00> : vector<8x16xf32>
    %296 = tpu.matmul %295, %277, %cst_158 {dimension_numbers = #tpu.dot_dimension_numbers<[1], [0], [0], [1], [0, 0, 1, 1], [], []>} : vector<8x8xf32>, vector<8x16xf32>, vector<8x16xf32> -> vector<8x16xf32>
    %297 = vector.extract_strided_slice %260 {offsets = [8, 0], sizes = [8, 16], strides = [1, 1]} : vector<16x16xf32> to vector<8x16xf32>
    %298 = vector.extract_strided_slice %267 {offsets = [8, 0], sizes = [8, 16], strides = [1, 1]} : vector<16x16xf32> to vector<8x16xf32>
    %299 = vector.extract_strided_slice %274 {offsets = [8, 0], sizes = [8, 16], strides = [1, 1]} : vector<16x16xf32> to vector<8x16xf32>
    %300 = tpu.transpose %298, [1, 0] : vector<8x16xf32> -> vector<16x8xf32>
    %cst_159 = arith.constant dense<0.000000e+00> : vector<8x8xf32>
    %301 = tpu.matmul %297, %300, %cst_159 {dimension_numbers = #tpu.dot_dimension_numbers<[1], [0], [0], [1], [0, 0, 1, 1], [], []>} : vector<8x16xf32>, vector<16x8xf32>, vector<8x8xf32> -> vector<8x8xf32>
    %cst_160 = arith.constant 2.500000e-01 : f32
    %302 = vector.broadcast %cst_160 : f32 to vector<8x8xf32>
    %303 = arith.mulf %301, %302 : vector<8x8xf32>
    %c1_161 = arith.constant 1 : index
    %c0_162 = arith.constant 0 : index
    %c0_163 = arith.constant 0 : index
    %304 = vector.load %arg1[%c1_161, %c0_162, %c0_163] : memref<2x1x8xf32, #tpu.memory_space<vmem>>, vector<1x1x8xf32>
    %305 = vector.shape_cast %304 : vector<1x1x8xf32> to vector<1x8xf32>
    %306 = vector.broadcast %305 : vector<1x8xf32> to vector<8x8xf32>
    %307 = arith.addf %303, %306 : vector<8x8xf32>
    %cst_164 = arith.constant dense<0xFF800000> : vector<8xf32>
    %308 = vector.multi_reduction <maximumf>, %307, %cst_164 [1] : vector<8x8xf32> to vector<8xf32>
    %309 = vector.shape_cast %308 : vector<8xf32> to vector<8x1xf32>
    %310 = vector.broadcast %309 : vector<8x1xf32> to vector<8x8xf32>
    %311 = arith.subf %307, %310 : vector<8x8xf32>
    %312 = math.exp %311 : vector<8x8xf32>
    %cst_165 = arith.constant dense<0.000000e+00> : vector<8xf32>
    %313 = vector.multi_reduction <add>, %312, %cst_165 [1] : vector<8x8xf32> to vector<8xf32>
    %314 = vector.shape_cast %313 : vector<8xf32> to vector<8x1xf32>
    %315 = tpu.reciprocal %314 {approx = true} : vector<8x1xf32> -> vector<8x1xf32>
    %316 = vector.broadcast %315 : vector<8x1xf32> to vector<8x8xf32>
    %317 = arith.mulf %312, %316 : vector<8x8xf32>
    %cst_166 = arith.constant dense<0.000000e+00> : vector<8x16xf32>
    %318 = tpu.matmul %317, %299, %cst_166 {dimension_numbers = #tpu.dot_dimension_numbers<[1], [0], [0], [1], [0, 0, 1, 1], [], []>} : vector<8x8xf32>, vector<8x16xf32>, vector<8x16xf32> -> vector<8x16xf32>
    %319 = tpu.concatenate %296, %318 in 0 : vector<8x16xf32>, vector<8x16xf32> -> vector<16x16xf32>
    %c2_167 = arith.constant 2 : index
    %c0_168 = arith.constant 0 : index
    %c0_169 = arith.constant 0 : index
    %320 = vector.load %arg4[%c2_167, %c0_168, %c0_169] : memref<4x16x32xf32, #tpu.memory_space<vmem>>, vector<1x16x32xf32>
    %321 = vector.shape_cast %320 : vector<1x16x32xf32> to vector<16x32xf32>
    %cst_170 = arith.constant dense<0.000000e+00> : vector<16x32xf32>
    %322 = tpu.matmul %319, %321, %cst_170 {dimension_numbers = #tpu.dot_dimension_numbers<[1], [0], [0], [1], [0, 0, 1, 1], [], []>} : vector<16x16xf32>, vector<16x32xf32>, vector<16x32xf32> -> vector<16x32xf32>
    %323 = arith.addf %253, %322 : vector<16x32xf32>
    %c7 = arith.constant 7 : index
    %c0_171 = arith.constant 0 : index
    %c0_172 = arith.constant 0 : index
    %324 = vector.load %arg2[%c7, %c0_171, %c0_172] : memref<12x32x16xf32, #tpu.memory_space<vmem>>, vector<1x32x16xf32>
    %325 = vector.shape_cast %324 : vector<1x32x16xf32> to vector<32x16xf32>
    %cst_173 = arith.constant dense<0.000000e+00> : vector<16x16xf32>
    %326 = tpu.matmul %252, %325, %cst_173 {dimension_numbers = #tpu.dot_dimension_numbers<[1], [0], [0], [1], [0, 0, 1, 1], [], []>} : vector<16x32xf32>, vector<32x16xf32>, vector<16x16xf32> -> vector<16x16xf32>
    %c7_174 = arith.constant 7 : index
    %c0_175 = arith.constant 0 : index
    %c0_176 = arith.constant 0 : index
    %327 = vector.load %arg3[%c7_174, %c0_175, %c0_176] : memref<12x1x16xf32, #tpu.memory_space<vmem>>, vector<1x1x16xf32>
    %328 = vector.shape_cast %327 : vector<1x1x16xf32> to vector<1x16xf32>
    %329 = vector.broadcast %328 : vector<1x16xf32> to vector<16x16xf32>
    %330 = arith.addf %326, %329 : vector<16x16xf32>
    %c9 = arith.constant 9 : index
    %c0_177 = arith.constant 0 : index
    %c0_178 = arith.constant 0 : index
    %331 = vector.load %arg2[%c9, %c0_177, %c0_178] : memref<12x32x16xf32, #tpu.memory_space<vmem>>, vector<1x32x16xf32>
    %332 = vector.shape_cast %331 : vector<1x32x16xf32> to vector<32x16xf32>
    %cst_179 = arith.constant dense<0.000000e+00> : vector<16x16xf32>
    %333 = tpu.matmul %252, %332, %cst_179 {dimension_numbers = #tpu.dot_dimension_numbers<[1], [0], [0], [1], [0, 0, 1, 1], [], []>} : vector<16x32xf32>, vector<32x16xf32>, vector<16x16xf32> -> vector<16x16xf32>
    %c9_180 = arith.constant 9 : index
    %c0_181 = arith.constant 0 : index
    %c0_182 = arith.constant 0 : index
    %334 = vector.load %arg3[%c9_180, %c0_181, %c0_182] : memref<12x1x16xf32, #tpu.memory_space<vmem>>, vector<1x1x16xf32>
    %335 = vector.shape_cast %334 : vector<1x1x16xf32> to vector<1x16xf32>
    %336 = vector.broadcast %335 : vector<1x16xf32> to vector<16x16xf32>
    %337 = arith.addf %333, %336 : vector<16x16xf32>
    %c11 = arith.constant 11 : index
    %c0_183 = arith.constant 0 : index
    %c0_184 = arith.constant 0 : index
    %338 = vector.load %arg2[%c11, %c0_183, %c0_184] : memref<12x32x16xf32, #tpu.memory_space<vmem>>, vector<1x32x16xf32>
    %339 = vector.shape_cast %338 : vector<1x32x16xf32> to vector<32x16xf32>
    %cst_185 = arith.constant dense<0.000000e+00> : vector<16x16xf32>
    %340 = tpu.matmul %252, %339, %cst_185 {dimension_numbers = #tpu.dot_dimension_numbers<[1], [0], [0], [1], [0, 0, 1, 1], [], []>} : vector<16x32xf32>, vector<32x16xf32>, vector<16x16xf32> -> vector<16x16xf32>
    %c11_186 = arith.constant 11 : index
    %c0_187 = arith.constant 0 : index
    %c0_188 = arith.constant 0 : index
    %341 = vector.load %arg3[%c11_186, %c0_187, %c0_188] : memref<12x1x16xf32, #tpu.memory_space<vmem>>, vector<1x1x16xf32>
    %342 = vector.shape_cast %341 : vector<1x1x16xf32> to vector<1x16xf32>
    %343 = vector.broadcast %342 : vector<1x16xf32> to vector<16x16xf32>
    %344 = arith.addf %340, %343 : vector<16x16xf32>
    %345 = vector.extract_strided_slice %330 {offsets = [0, 0], sizes = [8, 16], strides = [1, 1]} : vector<16x16xf32> to vector<8x16xf32>
    %346 = vector.extract_strided_slice %337 {offsets = [0, 0], sizes = [8, 16], strides = [1, 1]} : vector<16x16xf32> to vector<8x16xf32>
    %347 = vector.extract_strided_slice %344 {offsets = [0, 0], sizes = [8, 16], strides = [1, 1]} : vector<16x16xf32> to vector<8x16xf32>
    %348 = tpu.transpose %346, [1, 0] : vector<8x16xf32> -> vector<16x8xf32>
    %cst_189 = arith.constant dense<0.000000e+00> : vector<8x8xf32>
    %349 = tpu.matmul %345, %348, %cst_189 {dimension_numbers = #tpu.dot_dimension_numbers<[1], [0], [0], [1], [0, 0, 1, 1], [], []>} : vector<8x16xf32>, vector<16x8xf32>, vector<8x8xf32> -> vector<8x8xf32>
    %cst_190 = arith.constant 2.500000e-01 : f32
    %350 = vector.broadcast %cst_190 : f32 to vector<8x8xf32>
    %351 = arith.mulf %349, %350 : vector<8x8xf32>
    %c0_191 = arith.constant 0 : index
    %c0_192 = arith.constant 0 : index
    %c0_193 = arith.constant 0 : index
    %352 = vector.load %arg1[%c0_191, %c0_192, %c0_193] : memref<2x1x8xf32, #tpu.memory_space<vmem>>, vector<1x1x8xf32>
    %353 = vector.shape_cast %352 : vector<1x1x8xf32> to vector<1x8xf32>
    %354 = vector.broadcast %353 : vector<1x8xf32> to vector<8x8xf32>
    %355 = arith.addf %351, %354 : vector<8x8xf32>
    %cst_194 = arith.constant dense<0xFF800000> : vector<8xf32>
    %356 = vector.multi_reduction <maximumf>, %355, %cst_194 [1] : vector<8x8xf32> to vector<8xf32>
    %357 = vector.shape_cast %356 : vector<8xf32> to vector<8x1xf32>
    %358 = vector.broadcast %357 : vector<8x1xf32> to vector<8x8xf32>
    %359 = arith.subf %355, %358 : vector<8x8xf32>
    %360 = math.exp %359 : vector<8x8xf32>
    %cst_195 = arith.constant dense<0.000000e+00> : vector<8xf32>
    %361 = vector.multi_reduction <add>, %360, %cst_195 [1] : vector<8x8xf32> to vector<8xf32>
    %362 = vector.shape_cast %361 : vector<8xf32> to vector<8x1xf32>
    %363 = tpu.reciprocal %362 {approx = true} : vector<8x1xf32> -> vector<8x1xf32>
    %364 = vector.broadcast %363 : vector<8x1xf32> to vector<8x8xf32>
    %365 = arith.mulf %360, %364 : vector<8x8xf32>
    %cst_196 = arith.constant dense<0.000000e+00> : vector<8x16xf32>
    %366 = tpu.matmul %365, %347, %cst_196 {dimension_numbers = #tpu.dot_dimension_numbers<[1], [0], [0], [1], [0, 0, 1, 1], [], []>} : vector<8x8xf32>, vector<8x16xf32>, vector<8x16xf32> -> vector<8x16xf32>
    %367 = vector.extract_strided_slice %330 {offsets = [8, 0], sizes = [8, 16], strides = [1, 1]} : vector<16x16xf32> to vector<8x16xf32>
    %368 = vector.extract_strided_slice %337 {offsets = [8, 0], sizes = [8, 16], strides = [1, 1]} : vector<16x16xf32> to vector<8x16xf32>
    %369 = vector.extract_strided_slice %344 {offsets = [8, 0], sizes = [8, 16], strides = [1, 1]} : vector<16x16xf32> to vector<8x16xf32>
    %370 = tpu.transpose %368, [1, 0] : vector<8x16xf32> -> vector<16x8xf32>
    %cst_197 = arith.constant dense<0.000000e+00> : vector<8x8xf32>
    %371 = tpu.matmul %367, %370, %cst_197 {dimension_numbers = #tpu.dot_dimension_numbers<[1], [0], [0], [1], [0, 0, 1, 1], [], []>} : vector<8x16xf32>, vector<16x8xf32>, vector<8x8xf32> -> vector<8x8xf32>
    %cst_198 = arith.constant 2.500000e-01 : f32
    %372 = vector.broadcast %cst_198 : f32 to vector<8x8xf32>
    %373 = arith.mulf %371, %372 : vector<8x8xf32>
    %c1_199 = arith.constant 1 : index
    %c0_200 = arith.constant 0 : index
    %c0_201 = arith.constant 0 : index
    %374 = vector.load %arg1[%c1_199, %c0_200, %c0_201] : memref<2x1x8xf32, #tpu.memory_space<vmem>>, vector<1x1x8xf32>
    %375 = vector.shape_cast %374 : vector<1x1x8xf32> to vector<1x8xf32>
    %376 = vector.broadcast %375 : vector<1x8xf32> to vector<8x8xf32>
    %377 = arith.addf %373, %376 : vector<8x8xf32>
    %cst_202 = arith.constant dense<0xFF800000> : vector<8xf32>
    %378 = vector.multi_reduction <maximumf>, %377, %cst_202 [1] : vector<8x8xf32> to vector<8xf32>
    %379 = vector.shape_cast %378 : vector<8xf32> to vector<8x1xf32>
    %380 = vector.broadcast %379 : vector<8x1xf32> to vector<8x8xf32>
    %381 = arith.subf %377, %380 : vector<8x8xf32>
    %382 = math.exp %381 : vector<8x8xf32>
    %cst_203 = arith.constant dense<0.000000e+00> : vector<8xf32>
    %383 = vector.multi_reduction <add>, %382, %cst_203 [1] : vector<8x8xf32> to vector<8xf32>
    %384 = vector.shape_cast %383 : vector<8xf32> to vector<8x1xf32>
    %385 = tpu.reciprocal %384 {approx = true} : vector<8x1xf32> -> vector<8x1xf32>
    %386 = vector.broadcast %385 : vector<8x1xf32> to vector<8x8xf32>
    %387 = arith.mulf %382, %386 : vector<8x8xf32>
    %cst_204 = arith.constant dense<0.000000e+00> : vector<8x16xf32>
    %388 = tpu.matmul %387, %369, %cst_204 {dimension_numbers = #tpu.dot_dimension_numbers<[1], [0], [0], [1], [0, 0, 1, 1], [], []>} : vector<8x8xf32>, vector<8x16xf32>, vector<8x16xf32> -> vector<8x16xf32>
    %389 = tpu.concatenate %366, %388 in 0 : vector<8x16xf32>, vector<8x16xf32> -> vector<16x16xf32>
    %c3_205 = arith.constant 3 : index
    %c0_206 = arith.constant 0 : index
    %c0_207 = arith.constant 0 : index
    %390 = vector.load %arg4[%c3_205, %c0_206, %c0_207] : memref<4x16x32xf32, #tpu.memory_space<vmem>>, vector<1x16x32xf32>
    %391 = vector.shape_cast %390 : vector<1x16x32xf32> to vector<16x32xf32>
    %cst_208 = arith.constant dense<0.000000e+00> : vector<16x32xf32>
    %392 = tpu.matmul %389, %391, %cst_208 {dimension_numbers = #tpu.dot_dimension_numbers<[1], [0], [0], [1], [0, 0, 1, 1], [], []>} : vector<16x16xf32>, vector<16x32xf32>, vector<16x32xf32> -> vector<16x32xf32>
    %393 = arith.addf %323, %392 : vector<16x32xf32>
    %c1_209 = arith.constant 1 : index
    %c0_210 = arith.constant 0 : index
    %c0_211 = arith.constant 0 : index
    %394 = vector.load %arg5[%c1_209, %c0_210, %c0_211] : memref<2x1x32xf32, #tpu.memory_space<vmem>>, vector<1x1x32xf32>
    %395 = vector.shape_cast %394 : vector<1x1x32xf32> to vector<1x32xf32>
    %396 = vector.broadcast %395 : vector<1x32xf32> to vector<16x32xf32>
    %397 = arith.addf %393, %396 : vector<16x32xf32>
    %398 = arith.addf %397, %252 : vector<16x32xf32>
    %c6_212 = arith.constant 6 : index
    %c0_213 = arith.constant 0 : index
    %c0_214 = arith.constant 0 : index
    %399 = vector.load %arg10[%c6_212, %c0_213, %c0_214] : memref<10x1x32xf32, #tpu.memory_space<vmem>>, vector<1x1x32xf32>
    %400 = vector.shape_cast %399 : vector<1x1x32xf32> to vector<1x32xf32>
    %c7_215 = arith.constant 7 : index
    %c0_216 = arith.constant 0 : index
    %c0_217 = arith.constant 0 : index
    %401 = vector.load %arg10[%c7_215, %c0_216, %c0_217] : memref<10x1x32xf32, #tpu.memory_space<vmem>>, vector<1x1x32xf32>
    %402 = vector.shape_cast %401 : vector<1x1x32xf32> to vector<1x32xf32>
    %cst_218 = arith.constant dense<0.000000e+00> : vector<16xf32>
    %403 = vector.multi_reduction <add>, %398, %cst_218 [1] : vector<16x32xf32> to vector<16xf32>
    %404 = vector.shape_cast %403 : vector<16xf32> to vector<16x1xf32>
    %cst_219 = arith.constant 3.200000e+01 : f32
    %405 = vector.broadcast %cst_219 : f32 to vector<16x1xf32>
    %406 = arith.divf %404, %405 : vector<16x1xf32>
    %407 = vector.broadcast %406 : vector<16x1xf32> to vector<16x32xf32>
    %408 = arith.subf %398, %407 : vector<16x32xf32>
    %409 = arith.mulf %408, %408 : vector<16x32xf32>
    %cst_220 = arith.constant dense<0.000000e+00> : vector<16xf32>
    %410 = vector.multi_reduction <add>, %409, %cst_220 [1] : vector<16x32xf32> to vector<16xf32>
    %411 = vector.shape_cast %410 : vector<16xf32> to vector<16x1xf32>
    %cst_221 = arith.constant 3.200000e+01 : f32
    %412 = vector.broadcast %cst_221 : f32 to vector<16x1xf32>
    %413 = arith.divf %411, %412 : vector<16x1xf32>
    %414 = vector.broadcast %406 : vector<16x1xf32> to vector<16x32xf32>
    %415 = arith.subf %398, %414 : vector<16x32xf32>
    %cst_222 = arith.constant 9.99999974E-6 : f32
    %416 = vector.broadcast %cst_222 : f32 to vector<16x1xf32>
    %417 = arith.addf %413, %416 : vector<16x1xf32>
    %418 = math.rsqrt %417 : vector<16x1xf32>
    %419 = vector.broadcast %418 : vector<16x1xf32> to vector<16x32xf32>
    %420 = arith.mulf %415, %419 : vector<16x32xf32>
    %421 = vector.broadcast %400 : vector<1x32xf32> to vector<16x32xf32>
    %422 = arith.mulf %420, %421 : vector<16x32xf32>
    %423 = vector.broadcast %402 : vector<1x32xf32> to vector<16x32xf32>
    %424 = arith.addf %422, %423 : vector<16x32xf32>
    %c1_223 = arith.constant 1 : index
    %c0_224 = arith.constant 0 : index
    %c0_225 = arith.constant 0 : index
    %425 = vector.load %arg6[%c1_223, %c0_224, %c0_225] : memref<2x32x64xf32, #tpu.memory_space<vmem>>, vector<1x32x64xf32>
    %426 = vector.shape_cast %425 : vector<1x32x64xf32> to vector<32x64xf32>
    %cst_226 = arith.constant dense<0.000000e+00> : vector<16x64xf32>
    %427 = tpu.matmul %424, %426, %cst_226 {dimension_numbers = #tpu.dot_dimension_numbers<[1], [0], [0], [1], [0, 0, 1, 1], [], []>} : vector<16x32xf32>, vector<32x64xf32>, vector<16x64xf32> -> vector<16x64xf32>
    %c1_227 = arith.constant 1 : index
    %c0_228 = arith.constant 0 : index
    %c0_229 = arith.constant 0 : index
    %428 = vector.load %arg7[%c1_227, %c0_228, %c0_229] : memref<2x1x64xf32, #tpu.memory_space<vmem>>, vector<1x1x64xf32>
    %429 = vector.shape_cast %428 : vector<1x1x64xf32> to vector<1x64xf32>
    %430 = vector.broadcast %429 : vector<1x64xf32> to vector<16x64xf32>
    %431 = arith.addf %427, %430 : vector<16x64xf32>
    %432 = arith.mulf %431, %431 : vector<16x64xf32>
    %433 = arith.mulf %431, %432 : vector<16x64xf32>
    %cst_230 = arith.constant 4.471500e-02 : f32
    %434 = vector.broadcast %cst_230 : f32 to vector<16x64xf32>
    %435 = arith.mulf %434, %433 : vector<16x64xf32>
    %436 = arith.addf %431, %435 : vector<16x64xf32>
    %cst_231 = arith.constant 0.797884583 : f32
    %437 = vector.broadcast %cst_231 : f32 to vector<16x64xf32>
    %438 = arith.mulf %437, %436 : vector<16x64xf32>
    %439 = math.tanh %438 : vector<16x64xf32>
    %cst_232 = arith.constant 1.000000e+00 : f32
    %440 = vector.broadcast %cst_232 : f32 to vector<16x64xf32>
    %441 = arith.addf %440, %439 : vector<16x64xf32>
    %cst_233 = arith.constant 5.000000e-01 : f32
    %442 = vector.broadcast %cst_233 : f32 to vector<16x64xf32>
    %443 = arith.mulf %442, %441 : vector<16x64xf32>
    %444 = arith.mulf %431, %443 : vector<16x64xf32>
    %c1_234 = arith.constant 1 : index
    %c0_235 = arith.constant 0 : index
    %c0_236 = arith.constant 0 : index
    %445 = vector.load %arg8[%c1_234, %c0_235, %c0_236] : memref<2x64x32xf32, #tpu.memory_space<vmem>>, vector<1x64x32xf32>
    %446 = vector.shape_cast %445 : vector<1x64x32xf32> to vector<64x32xf32>
    %cst_237 = arith.constant dense<0.000000e+00> : vector<16x32xf32>
    %447 = tpu.matmul %444, %446, %cst_237 {dimension_numbers = #tpu.dot_dimension_numbers<[1], [0], [0], [1], [0, 0, 1, 1], [], []>} : vector<16x64xf32>, vector<64x32xf32>, vector<16x32xf32> -> vector<16x32xf32>
    %c1_238 = arith.constant 1 : index
    %c0_239 = arith.constant 0 : index
    %c0_240 = arith.constant 0 : index
    %448 = vector.load %arg9[%c1_238, %c0_239, %c0_240] : memref<2x1x32xf32, #tpu.memory_space<vmem>>, vector<1x1x32xf32>
    %449 = vector.shape_cast %448 : vector<1x1x32xf32> to vector<1x32xf32>
    %450 = vector.broadcast %449 : vector<1x32xf32> to vector<16x32xf32>
    %451 = arith.addf %447, %450 : vector<16x32xf32>
    %452 = arith.addf %451, %424 : vector<16x32xf32>
    %c8_241 = arith.constant 8 : index
    %c0_242 = arith.constant 0 : index
    %c0_243 = arith.constant 0 : index
    %453 = vector.load %arg10[%c8_241, %c0_242, %c0_243] : memref<10x1x32xf32, #tpu.memory_space<vmem>>, vector<1x1x32xf32>
    %454 = vector.shape_cast %453 : vector<1x1x32xf32> to vector<1x32xf32>
    %c9_244 = arith.constant 9 : index
    %c0_245 = arith.constant 0 : index
    %c0_246 = arith.constant 0 : index
    %455 = vector.load %arg10[%c9_244, %c0_245, %c0_246] : memref<10x1x32xf32, #tpu.memory_space<vmem>>, vector<1x1x32xf32>
    %456 = vector.shape_cast %455 : vector<1x1x32xf32> to vector<1x32xf32>
    %cst_247 = arith.constant dense<0.000000e+00> : vector<16xf32>
    %457 = vector.multi_reduction <add>, %452, %cst_247 [1] : vector<16x32xf32> to vector<16xf32>
    %458 = vector.shape_cast %457 : vector<16xf32> to vector<16x1xf32>
    %cst_248 = arith.constant 3.200000e+01 : f32
    %459 = vector.broadcast %cst_248 : f32 to vector<16x1xf32>
    %460 = arith.divf %458, %459 : vector<16x1xf32>
    %461 = vector.broadcast %460 : vector<16x1xf32> to vector<16x32xf32>
    %462 = arith.subf %452, %461 : vector<16x32xf32>
    %463 = arith.mulf %462, %462 : vector<16x32xf32>
    %cst_249 = arith.constant dense<0.000000e+00> : vector<16xf32>
    %464 = vector.multi_reduction <add>, %463, %cst_249 [1] : vector<16x32xf32> to vector<16xf32>
    %465 = vector.shape_cast %464 : vector<16xf32> to vector<16x1xf32>
    %cst_250 = arith.constant 3.200000e+01 : f32
    %466 = vector.broadcast %cst_250 : f32 to vector<16x1xf32>
    %467 = arith.divf %465, %466 : vector<16x1xf32>
    %468 = vector.broadcast %460 : vector<16x1xf32> to vector<16x32xf32>
    %469 = arith.subf %452, %468 : vector<16x32xf32>
    %cst_251 = arith.constant 9.99999974E-6 : f32
    %470 = vector.broadcast %cst_251 : f32 to vector<16x1xf32>
    %471 = arith.addf %467, %470 : vector<16x1xf32>
    %472 = math.rsqrt %471 : vector<16x1xf32>
    %473 = vector.broadcast %472 : vector<16x1xf32> to vector<16x32xf32>
    %474 = arith.mulf %469, %473 : vector<16x32xf32>
    %475 = vector.broadcast %454 : vector<1x32xf32> to vector<16x32xf32>
    %476 = arith.mulf %474, %475 : vector<16x32xf32>
    %477 = vector.broadcast %456 : vector<1x32xf32> to vector<16x32xf32>
    %478 = arith.addf %476, %477 : vector<16x32xf32>
    %c0_252 = arith.constant 0 : index
    %c0_253 = arith.constant 0 : index
    %c0_254 = arith.constant 0 : index
    %479 = vector.load %arg11[%c0_252, %c0_253, %c0_254] : memref<2x32x128xf32, #tpu.memory_space<vmem>>, vector<1x32x128xf32>
    %480 = vector.shape_cast %479 : vector<1x32x128xf32> to vector<32x128xf32>
    %cst_255 = arith.constant dense<0.000000e+00> : vector<16x128xf32>
    %481 = tpu.matmul %478, %480, %cst_255 {dimension_numbers = #tpu.dot_dimension_numbers<[1], [0], [0], [1], [0, 0, 1, 1], [], []>} : vector<16x32xf32>, vector<32x128xf32>, vector<16x128xf32> -> vector<16x128xf32>
    %c1_256 = arith.constant 1 : index
    %c0_257 = arith.constant 0 : index
    %c0_258 = arith.constant 0 : index
    %482 = vector.load %arg11[%c1_256, %c0_257, %c0_258] : memref<2x32x128xf32, #tpu.memory_space<vmem>>, vector<1x32x128xf32>
    %483 = vector.shape_cast %482 : vector<1x32x128xf32> to vector<32x128xf32>
    %cst_259 = arith.constant dense<0.000000e+00> : vector<16x128xf32>
    %484 = tpu.matmul %252, %483, %cst_259 {dimension_numbers = #tpu.dot_dimension_numbers<[1], [0], [0], [1], [0, 0, 1, 1], [], []>} : vector<16x32xf32>, vector<32x128xf32>, vector<16x128xf32> -> vector<16x128xf32>
    %485 = arith.addf %481, %484 : vector<16x128xf32>
    %c0_260 = arith.constant 0 : index
    %c0_261 = arith.constant 0 : index
    %486 = vector.load %arg12[%c0_260, %c0_261] : memref<1x128xf32, #tpu.memory_space<vmem>>, vector<1x128xf32>
    %487 = vector.broadcast %486 : vector<1x128xf32> to vector<16x128xf32>
    %488 = arith.addf %485, %487 : vector<16x128xf32>
    %c0_262 = arith.constant 0 : index
    %c0_263 = arith.constant 0 : index
    %489 = vector.load %arg13[%c0_262, %c0_263] : memref<16x128xf32, #tpu.memory_space<vmem>>, vector<16x128xf32>
    tpu.vector_store %arg13[%c0_262, %c0_263], %488 {strides = array<i32>} : memref<16x128xf32, #tpu.memory_space<vmem>>, vector<16x128xf32>,
    return
  }
}

</mosaic_0001>

<bundles_post_ra>
// kernel: squeeze.3
= control target key start
LH: loop header
LB: loop body
LE: loop exit
PB: predicated region body
PF: predicated region fallthrough
CT: control target
= control target key end

     0   :  { %s85_s0 = inlined_call_operand.vmem [shape: f32[16], index: 0, kind: input, shape index: {}]   ;;  %s86_s1 = inlined_call_operand.hbm [shape: f32[2,8], index: 1, kind: output, shape index: {}]  }
   0x1   :  { %v5_v0 = vld [vmem:[%s85_s0] sm:$0x1] }
   0x2   :  { %2 = vsyncpa [#allocation1], 0  ;;  %6 = vst [vmem:[#allocation3] sm:$0x1] %v5_v0  ;;  %vm8_vm0 = vcmask 64512   ;;  %s58_s0 = smov 120  }
   0x3   :  { %s59_s8 = smov [#allocation0]  }
   0x4   :  { %s26_s9 = sshll.u32 %s59_s8, 4  ;;  %s27_s9 = int_to_ptr.vmem [resolvable:$true] %s26_s9 }
   0x5   :  { %s34_s10 = scalar_lea.vmem %s27_s9, 32  ;;  %p39_p1 = scmp.lt.s32.totalorder %s27_s9, %s27_s9 }
   0x6   :  { %p35_p0 = scmp.ne.s32.totalorder %s27_s9, %s34_s10  ;;  %p40_p2 = scmp.lt.s32.totalorder %s34_s10, %s34_s10 }
   0x8   :  { %p41_p3 = por %p40_p2, %p39_p1 }
   0x9   :  { %v10_v1 = vld [vmem:[#allocation3] sm:$0x1]  }
   0xa   :  { %v7_v2 = vld [vmem:[#allocation3] sm:$0x1]   ;;  %11 = vrot.lane.b32.xlu0 %v10_v1, %s58_s0  ;;  %p42_p4 = pnand %p41_p3, %p35_p0 }
   0xb   :  { %9 = vst.msk [vmem:[#allocation2] sm:$0x1] %vm8_vm0, %v7_v2  }
  0x7c   :  { %v12_v3 = vpop.permute.xlu0 %11  }
  0x7d   :  { %15 = vst.msk [vmem:[#allocation2 + $0x1] sm:$0x1] %vm8_vm0, %v12_v3  }
  0x84   :  { %v19_v4 = vld [vmem:[#allocation2] sm:$0x3] }
  0x85   :  { %21 = vst [vmem:[#allocation0] sm:$0x3] %v19_v4 }
  0x86   :  { %45 = shalt.err (!%p42_p4)
}
  0x87   :  { %s46_s13 = scalar_lea.hbm %s86_s1, 32 }
  0x88   :  { %p47_p5 = scmp.ne.s32.totalorder %s86_s1, %s46_s13  ;;  %p50_p6 = scmp.lt.u32.totalorder %s46_s13, %s86_s1 }
  0x8a   :  { %p52_p7 = pnand %p50_p6, %p47_p5 }
  0x8c   :  { %55 = shalt.err (!%p52_p7)
}
  0x8d   :  { %29 = dma.vmem_to_hbm [thread:$0]  %s27_s9, 32, %s86_s1, [#allocation1]  }
  0x8e   :  { %56 = dma.done.wait [#allocation1], 32  }
  0x8f   :  { %57 = vsyncadd [#allocation1], 4294967264 }
  0x90   :  { %31 = vsyncpa [#allocation1], 1 }

// kernel: tweet_model_forward.1
= control target key start
LH: loop header
LB: loop body
LE: loop exit
PB: predicated region body
PF: predicated region fallthrough
CT: control target
= control target key end

     0   :  { %vm49_vm0 = vcmask 261120   ;;  %v4534_v48 = vmov 0.0   ;;  %vm4535_vm1 = vmmov 0   ;;  %vm361_vm2 = vcmask 130048   ;;  %s5205_s0 = inlined_call_operand.vmem [shape: f32[16,32], index: 0, kind: input, shape index: {}]   ;;  %s5206_s2 = inlined_call_operand.vmem [shape: f32[12,32,16], index: 2, kind: input, shape index: {}]   ;;  %s5207_s10 = inlined_call_operand.vmem [shape: f32[10,1,32], index: 10, kind: input, shape index: {}]   ;;  %s5208_s3 = inlined_call_operand.vmem [shape: f32[12,1,16], index: 3, kind: input, shape index: {}]   ;;  %s5209_s1 = inlined_call_operand.vmem [shape: f32[2,1,8], index: 1, kind: input, shape index: {}]   ;;  %s5210_s4 = inlined_call_operand.vmem [shape: f32[4,16,32], index: 4, kind: input, shape index: {}]   ;;  %s5211_s5 = inlined_call_operand.vmem [shape: f32[2,1,32], index: 5, kind: input, shape index: {}]   ;;  %s5212_s6 = inlined_call_operand.vmem [shape: f32[2,32,64], index: 6, kind: input, shape index: {}]   ;;  %s5213_s8 = inlined_call_operand.vmem [shape: f32[2,64,32], index: 8, kind: input, shape index: {}]   ;;  %s5214_s7 = inlined_call_operand.vmem [shape: f32[2,1,64], index: 7, kind: input, shape index: {}]   ;;  %s5215_s9 = inlined_call_operand.vmem [shape: f32[2,1,32], index: 9, kind: input, shape index: {}]   ;;  %s5216_s11 = inlined_call_operand.vmem [shape: f32[2,32,128], index: 11, kind: input, shape index: {}]   ;;  %s5217_s12 = inlined_call_operand.vmem [shape: f32[1,128], index: 12, kind: input, shape index: {}]   ;;  %s5218_s13 = inlined_call_operand.vmem [shape: f32[16,128], index: 13, kind: output, shape index: {}]  }
   0x1   :  { %v44_v0 = vld [vmem:[%s5205_s0] sm:$0xff]  ;;  %v45_v1 = vld [vmem:[%s5205_s0 + $0x8] sm:$0xff]  ;;  %v95_v20 = vld [vmem:[%s5206_s2 + $0x10] sm:$0xff]  ;;  %vm447_vm3 = vcmask 64512   ;;  %vm1639_vm4 = vcmask 523264  }
   0x2   :  { %v50_v2 = vsel %vm49_vm0, %v44_v0, 0.0  ;;  %v53_v3 = vsel %vm49_vm0, %v45_v1, 0.0  ;;  %v93_v14 = vld [vmem:[%s5206_s2] sm:$0xff]  ;;  %v94_v15 = vld [vmem:[%s5206_s2 + $0x8] sm:$0xff]  ;;  %v96_v21 = vld [vmem:[%s5206_s2 + $0x18] sm:$0xff] }
   0x3   :  { %51 = vadd.xlane.f32.xlu0 %v50_v2  ;;  %v4290_v16 = vpack.c.bf16 %v94_v15, %v93_v14  ;;  %v3621_v17 = vld [vmem:[%s5206_s2 + $0x40] sm:$0xff]  ;;  %v3622_v18 = vld [vmem:[%s5206_s2 + $0x48] sm:$0xff]  ;;  %v4294_v22 = vpack.c.bf16 %v96_v21, %v95_v20  ;;  %v3623_v23 = vld [vmem:[%s5206_s2 + $0x50] sm:$0xff] }
   0x4   :  { %v4298_v19 = vpack.c.bf16 %v3622_v18, %v3621_v17  ;;  %v3624_v24 = vld [vmem:[%s5206_s2 + $0x58] sm:$0xff]  ;;  %v3629_v26 = vld [vmem:[%s5206_s2 + $0x80] sm:$0xff]  ;;  %v3630_v27 = vld [vmem:[%s5206_s2 + $0x88] sm:$0xff] }
   0x5   :  { %4291 = vmatprep.subr.bf16.mxu0 %v4290_v16  ;;  %v4302_v25 = vpack.c.bf16 %v3624_v24, %v3623_v23  ;;  %v4306_v28 = vpack.c.bf16 %v3630_v27, %v3629_v26  ;;  %v3616_v36 = vld [vmem:[%s5207_s10] ss:$0 sm:$0xff]  ;;  %v3617_v38 = vld [vmem:[%s5207_s10 + $0x1] ss:$0 sm:$0xff]  ;;  %v3631_v43 = vld [vmem:[%s5206_s2 + $0x90] sm:$0xff] }
   0x6   :  { %4293 = vmatpush3.bf16.msra.mxu0 %v4290_v16  ;;  %4299 = vmatprep.subr.bf16.mxu1 %v4298_v19  ;;  %v3632_v44 = vld [vmem:[%s5206_s2 + $0x98] sm:$0xff]  ;;  %v3646_v49 = vld [vmem:[%s5206_s2 + $0x20] sm:$0xff]  ;;  %v3647_v50 = vld [vmem:[%s5206_s2 + $0x28] sm:$0xff] }
   0x7   :  { %54 = vadd.xlane.f32.xlu0 %v53_v3  ;;  %4301 = vmatpush3.bf16.msra.mxu1 %v4298_v19  ;;  %v4310_v47 = vpack.c.bf16 %v3632_v44, %v3631_v43  ;;  %v3626_v51 = vld [vmem:[%s5208_s3 + $0x2] ss:$0 sm:$0xff]  ;;  %v4314_v54 = vpack.c.bf16 %v3647_v50, %v3646_v49  ;;  %v3618_v55 = vld [vmem:[%s5208_s3] ss:$0 sm:$0xff]  ;;  %v3648_v59 = vld [vmem:[%s5206_s2 + $0x30] sm:$0xff] }
   0x8   :  { %4295 = vmatprep.subr.bf16.mxu0 %v4294_v22  ;;  %4303 = vmatprep.subr.bf16.mxu1 %v4302_v25  ;;  %v3649_v60 = vld [vmem:[%s5206_s2 + $0x38] sm:$0xff]  ;;  %v3663_v2 = vld [vmem:[%s5206_s2 + $0xa8] sm:$0xff]  ;;  %v3634_v3 = vld [vmem:[%s5208_s3 + $0x4] ss:$0 sm:$0xff] }
   0x9   :  { %v4318_v63 = vpack.c.bf16 %v3649_v60, %v3648_v59  ;;  %v4742_v17 = vld [vmem:[%s5209_s1] ss:$0 sm:$0xff]  ;;  %v3667_v26 = vld [vmem:[%s5208_s3 + $0x5] ss:$0 sm:$0xff]  ;;  %v3655_v44 = vld [vmem:[%s5206_s2 + $0x68] sm:$0xff] }
   0xa   :  { %4297 = vmatpush3.bf16.msra.mxu0 %v4294_v22  ;;  %v3654_v43 = vld [vmem:[%s5206_s2 + $0x60] sm:$0xff] }
   0xb   :  { %4305 = vmatpush3.bf16.msra.mxu1 %v4302_v25  ;;  %4307 = vmatprep.subr.bf16.mxu0 %v4306_v28  ;;  %v4322_v49 = vpack.c.bf16 %v3655_v44, %v3654_v43  ;;  %v3659_v59 = vld [vmem:[%s5208_s3 + $0x3] ss:$0 sm:$0xff]  ;;  %v3682_v43 = vld [vmem:[%s5211_s5] ss:$0 sm:$0xff] }
   0xc   :  { %4001 = vmatprep.subr.mxu1 %v4534_v48 }
  0x90   :  { %v52_v4 = vpop.xlane.xlu0 %51 }
  0x91   :  { %v57_v5 = vmul.f32 0.03125, %v52_v4 }
  0x93   :  { %v59_v6 = vsub.f32 %v44_v0, %v57_v5 }
  0x94   :  { %v55_v7 = vpop.xlane.xlu0 %54 }
  0x95   :  { %v58_v8 = vmul.f32 0.03125, %v55_v7  ;;  %v61_v9 = vmul.f32 %v59_v6, %v59_v6 }
  0x97   :  { %v60_v10 = vsub.f32 %v45_v1, %v58_v8  ;;  %v63_v11 = vsel %vm49_vm0, %v61_v9, 0.0  ;;  %v3662_v1 = vld [vmem:[%s5206_s2 + $0xa0] sm:$0xff]  ;;  %v3664_v8 = vld [vmem:[%s5206_s2 + $0xb0] sm:$0xff]  ;;  %v3665_v9 = vld [vmem:[%s5206_s2 + $0xb8] sm:$0xff] }
  0x98   :  { %64 = vadd.xlane.f32.xlu1 %v63_v11  ;;  %v4330_v5 = vpack.c.bf16 %v3663_v2, %v3662_v1  ;;  %v4334_v11 = vpack.c.bf16 %v3665_v9, %v3664_v8 }
  0x99   :  { %v62_v12 = vmul.f32 %v60_v10, %v60_v10 }
  0x9b   :  { %v66_v13 = vsel %vm49_vm0, %v62_v12, 0.0 }
  0x9c   :  { %67 = vadd.xlane.f32.xlu1 %v66_v13  ;;  %v4737_v13 = vld [vmem:[%s5209_s1 + $0x1] ss:$0 sm:$0xff] }
 0x125   :  { %v65_v29 = vpop.xlane.xlu1 %64 }
 0x126   :  { %v69_v30 = vmul.f32 0.03125, %v65_v29 }
 0x128   :  { %v71_v31 = vadd.f32 1e-05, %v69_v30 }
 0x129   :  { %v68_v32 = vpop.xlane.xlu1 %67 }
 0x12a   :  { %4474 = vrsqrt.f32 %v71_v31  ;;  %v70_v33 = vmul.f32 0.03125, %v68_v32 }
 0x12c   :  { %v72_v34 = vadd.f32 1e-05, %v70_v33 }
 0x12e   :  { %4476 = vrsqrt.f32 %v72_v34 }
 0x134   :  { %v4475_v35 = vpop.eup %4474 }
 0x135   :  { %v75_v37 = vmul.f32 %v4475_v35, %v59_v6 }
 0x137   :  { %v83_v39 = vmul.f32 %v3616_v36, %v75_v37 }
 0x138   :  { %v4477_v40 = vpop.eup %4476 }
 0x139   :  { %v4652_v41 = vadd.f32 %v3617_v38, %v83_v39  ;;  %v76_v42 = vmul.f32 %v4477_v40, %v60_v10 }
 0x13b   :  { %v84_v45 = vmul.f32 %v3616_v36, %v76_v42  ;;  %3976 = vmatprep.mubr.msk.f32.mxu0 %vm49_vm0, %v4652_v41  ;;  %3987 = vmatprep.mubr.msk.f32.mxu1 %vm49_vm0, %v4652_v41 }
 0x13d   :  { %v4664_v46 = vadd.f32 %v3617_v38, %v84_v45 }
 0x13f   :  { %3977 = vmatmul.mubr.msk.f32.vlgmr.msra.gmra.mrb[0].mxu0 %vm49_vm0, %v4664_v46  ;;  %3988 = vmatmul.mubr.msk.f32.vlgmr.msra.gmra.mrb[0].mxu1 %vm49_vm0, %v4664_v46 }
 0x140   :  { %4309 = vmatpush3.bf16.msra.mxu0 %v4306_v28  ;;  %3998 = vmatprep.mubr.msk.f32.mxu0 %vm49_vm0, %v4652_v41 }
 0x141   :  { %4311 = vmatprep.subr.bf16.mxu0 %v4310_v47  ;;  %4003 = vmatprep.mubr.msk.f32.mxu1 %vm4535_vm1, %v4534_v48 }
 0x144   :  { %4313 = vmatpush3.bf16.msra.mxu0 %v4310_v47 }
 0x145   :  { %4011 = vmatprep.subr.mxu0 %v4534_v48 }
 0x147   :  { %3999 = vmatmul.mubr.msk.f32.vlgmr.msra.gmra.mrb[2].mxu0 %vm49_vm0, %v4664_v46 }
 0x148   :  { %4013 = vmatprep.mubr.msk.f32.mxu0 %vm4535_vm1, %v4534_v48 }
 0x212   :  { %v3978_v52 = vpop.f32.mrb[0].mxu0  ;;  %v3989_v53 = vpop.f32.mrb[0].mxu1 }
 0x213   :  { %v270_v56 = vadd.f32 %v3989_v53, %v3626_v51  ;;  %v176_v57 = vpop.f32.mrb[1].mxu0  ;;  %v264_v58 = vpop.f32.mrb[1].mxu1  ;;  %v182_v62 = vadd.f32 %v3978_v52, %v3618_v55  ;;  %v3657_v52 = vld [vmem:[%s5206_s2 + $0x78] sm:$0xff] }
 0x214   :  { %v265_v61 = vadd.f32 %v3626_v51, %v264_v58  ;;  %v177_v0 = vadd.f32 %v3618_v55, %v176_v57  ;;  %v3656_v51 = vld [vmem:[%s5206_s2 + $0x70] sm:$0xff] }
 0x215   :  { %4012 = vmatpush3.xpose.msk.msra.mxu0 %vm361_vm2, %v270_v56 }
 0x216   :  { %4002 = vmatpush3.xpose.msk.msra.mxu1 %vm361_vm2, %v265_v61  ;;  %4315 = vmatprep.subr.bf16.mxu0 %v4314_v54  ;;  %v3651_v61 = vld [vmem:[%s5208_s3 + $0x1] ss:$0 sm:$0xff] }
 0x217   :  { %4006 = vmatprep.subr.mxu1 %v4534_v48 }
 0x218   :  { %4014 = vmatmul.mubr.msk.f32.vlgmr.msra.gmra.mrb[4].mxu0 %vm361_vm2, %v182_v62 }
 0x219   :  { %4004 = vmatmul.mubr.msk.f32.vlgmr.msra.gmra.mrb[2].mxu1 %vm361_vm2, %v177_v0  ;;  %4317 = vmatpush3.bf16.msra.mxu0 %v4314_v54  ;;  %v4326_v54 = vpack.c.bf16 %v3657_v52, %v3656_v51 }
 0x21a   :  { %v4000_v4 = vpop.f32.mrb[2].mxu0  ;;  %4029 = vmatprep.mubr.msk.f32.mxu0 %vm49_vm0, %v4652_v41  ;;  %4319 = vmatprep.subr.bf16.mxu0 %v4318_v63 }
 0x21b   :  { %v4714_v6 = vadd.f32 %v4000_v4, %v3634_v3  ;;  %v352_v7 = vpop.f32.mrb[3].mxu0  ;;  %4008 = vmatprep.mubr.msk.f32.mxu1 %vm4535_vm1, %v4534_v48 }
 0x21c   :  { %v353_v10 = vadd.f32 %v3634_v3, %v352_v7 }
 0x21d   :  { %4321 = vmatpush3.bf16.msra.mxu0 %v4318_v63 }
 0x21e   :  { %4007 = vmatpush3.msra.mxu1 %v353_v10  ;;  %4331 = vmatprep.subr.bf16.mxu0 %v4330_v5 }
 0x21f   :  { %4016 = vmatprep.subr.mxu1 %v4534_v48 }
 0x220   :  { %4030 = vmatmul.mubr.msk.f32.vlgmr.msra.gmra.mrb[6].mxu0 %vm49_vm0, %v4664_v46 }
 0x221   :  { %4333 = vmatpush3.bf16.msra.mxu0 %v4330_v5  ;;  %4051 = vmatprep.mubr.msk.f32.mxu0 %vm49_vm0, %v4652_v41 }
 0x222   :  { %4335 = vmatprep.subr.bf16.mxu0 %v4334_v11 }
 0x225   :  { %4337 = vmatpush3.bf16.msra.mxu0 %v4334_v11 }
 0x226   :  { %4064 = vmatprep.subr.mxu0 %v4534_v48 }
 0x228   :  { %4052 = vmatmul.mubr.msk.f32.vlgmr.msra.gmra.mrb[8].mxu0 %vm49_vm0, %v4664_v46 }
 0x229   :  { %4066 = vmatprep.mubr.msk.f32.mxu0 %vm4535_vm1, %v4534_v48 }
 0x2eb   :  { %v604_v12 = vpop.f32.mrb[4].mxu0 }
 0x2ec   :  { %v608_v14 = vmul.f32 0.25, %v604_v12  ;;  %v434_v15 = vpop.f32.mrb[2].mxu1  ;;  %v4015_v16 = vpop.f32.mrb[5].mxu0 }
 0x2ed   :  { %v438_v18 = vmul.f32 0.25, %v434_v15  ;;  %v4005_v19 = vpop.f32.mrb[3].mxu1 }
 0x2ee   :  { %v617_v20 = vadd.f32 %v4737_v13, %v608_v14 }
 0x2ef   :  { %v446_v21 = vadd.f32 %v4742_v17, %v438_v18 }
 0x2f0   :  { %v618_v22 = vsel %vm447_vm3, %v617_v20, -inf }
 0x2f1   :  { %619 = vmax.xlane.f32.xlu1 %v618_v22  ;;  %v448_v23 = vsel %vm447_vm3, %v446_v21, -inf }
 0x2f2   :  { %449 = vmax.xlane.f32.xlu0 %v448_v23 }
 0x2f3   :  { %v4031_v24 = vpop.f32.mrb[6].mxu0 }
 0x2f4   :  { %v783_v25 = vpop.f32.mrb[7].mxu0  ;;  %v789_v1 = vadd.f32 %v4031_v24, %v3651_v61 }
 0x2f5   :  { %v784_v2 = vadd.f32 %v3651_v61, %v783_v25 }
 0x2fb   :  { %v4053_v27 = vpop.f32.mrb[8].mxu0 }
 0x2fc   :  { %v4751_v28 = vadd.f32 %v4053_v27, %v3667_v26  ;;  %v959_v29 = vpop.f32.mrb[9].mxu0 }
 0x2fd   :  { %v960_v3 = vadd.f32 %v3667_v26, %v959_v29 }
 0x37e   :  { %v620_v30 = vpop.xlane.xlu1 %619 }
 0x37f   :  { %v621_v31 = vsub.f32 %v617_v20, %v620_v30  ;;  %v450_v32 = vpop.xlane.xlu0 %449 }
 0x380   :  { %v451_v33 = vsub.f32 %v446_v21, %v450_v32 }
 0x381   :  { %v622_v34 = vmul.f32 1.442695, %v621_v31 }
 0x382   :  { %v452_v35 = vmul.f32 1.442695, %v451_v33  ;;  %v3676_v33 = vld [vmem:[%s5210_s4 + $0x10] sm:$0xff] }
 0x383   :  { %4478 = vpow2.f32 %v622_v34  ;;  %v3677_v34 = vld [vmem:[%s5210_s4 + $0x18] sm:$0xff] }
 0x384   :  { %4480 = vpow2.f32 %v452_v35  ;;  %v4338_v35 = vpack.c.bf16 %v3677_v34, %v3676_v33  ;;  %v1631_v33 = vld [vmem:[%s5213_s8 + $0x38] sm:$0xff] }
 0x38d   :  { %v4479_v36 = vpop.eup %4478 }
 0x38e   :  { %v4481_v37 = vpop.eup %4480  ;;  %v624_v38 = vsel %vm447_vm3, %v4479_v36, 0.0 }
 0x38f   :  { %625 = vadd.xlane.f32.xlu1 %v624_v38  ;;  %v454_v39 = vsel %vm447_vm3, %v4481_v37, 0.0 }
 0x390   :  { %455 = vadd.xlane.f32.xlu0 %v454_v39 }
 0x41c   :  { %v626_v40 = vpop.xlane.xlu1 %625 }
 0x41d   :  { %v456_v42 = vpop.xlane.xlu0 %455 }
 0x41e   :  { %4482 = vrcp.f32 %v456_v42 }
 0x41f   :  { %4484 = vrcp.f32 %v626_v40 }
 0x428   :  { %v4483_v45 = vpop.eup %4482 }
 0x429   :  { %v458_v47 = vmul.f32 %v4483_v45, %v4481_v37  ;;  %v4485_v50 = vpop.eup %4484 }
 0x42a   :  { %v628_v53 = vmul.f32 %v4485_v50, %v4479_v36  ;;  %v703_v36 = vld [vmem:[%s5210_s4 + $0x8] sm:$0xff] }
 0x42b   :  { %4009 = vmatmul.mubr.msk.f32.vlgmr.msra.gmra.mrb[4].mxu1 %vm447_vm3, %v458_v47 }
 0x42c   :  { %4017 = vmatpush3.msra.mxu1 %v4714_v6  ;;  %4018 = vmatprep.mubr.msk.f32.mxu1 %vm4535_vm1, %v4534_v48 }
 0x42d   :  { %4323 = vmatprep.subr.bf16.mxu1 %v4322_v49 }
 0x42f   :  { %4019 = vmatmul.mubr.msk.f32.vlgmr.msra.gmra.mrb[6].mxu1 %vm447_vm3, %v628_v53 }
 0x430   :  { %4325 = vmatpush3.bf16.msra.mxu1 %v4322_v49  ;;  %4040 = vmatprep.mubr.msk.f32.mxu1 %vm49_vm0, %v4652_v41 }
 0x431   :  { %4327 = vmatprep.subr.bf16.mxu1 %v4326_v54 }
 0x434   :  { %4329 = vmatpush3.bf16.msra.mxu1 %v4326_v54 }
 0x435   :  { %4054 = vmatprep.subr.mxu1 %v4534_v48 }
 0x437   :  { %4041 = vmatmul.mubr.msk.f32.vlgmr.msra.gmra.mrb[8].mxu1 %vm49_vm0, %v4664_v46 }
 0x438   :  { %4056 = vmatprep.mubr.msk.f32.mxu1 %vm4535_vm1, %v4534_v48 }
 0x4fe   :  { %v4779_v55 = vpop.f32.mrb[4].mxu1 }
 0x4ff   :  { %v4010_v56 = vpop.f32.mrb[5].mxu1 }
 0x502   :  { %v4781_v57 = vpop.f32.mrb[6].mxu1 }
 0x503   :  { %v4020_v58 = vpop.f32.mrb[7].mxu1 }
 0x50a   :  { %v4042_v60 = vpop.f32.mrb[8].mxu1 }
 0x50b   :  { %v877_v62 = vadd.f32 %v4042_v60, %v3659_v59  ;;  %v871_v63 = vpop.f32.mrb[9].mxu1 }
 0x50c   :  { %v872_v0 = vadd.f32 %v3659_v59, %v871_v63  ;;  %v1515_v63 = vld [vmem:[%s5212_s6 + $0x8] sm:$0xff] }
 0x50d   :  { %4065 = vmatpush3.xpose.msk.msra.mxu0 %vm361_vm2, %v877_v62 }
 0x50e   :  { %4055 = vmatpush3.xpose.msk.msra.mxu1 %vm361_vm2, %v872_v0  ;;  %4339 = vmatprep.subr.bf16.mxu0 %v4338_v35 }
 0x50f   :  { %4059 = vmatprep.subr.mxu1 %v4534_v48 }
 0x510   :  { %4067 = vmatmul.mubr.msk.f32.vlgmr.msra.gmra.mrb[10].mxu0 %vm361_vm2, %v789_v1  ;;  %v1516_v1 = vld [vmem:[%s5212_s6 + $0x10] sm:$0xff] }
 0x511   :  { %4057 = vmatmul.mubr.msk.f32.vlgmr.msra.gmra.mrb[10].mxu1 %vm361_vm2, %v784_v2  ;;  %4341 = vmatpush3.bf16.msra.mxu0 %v4338_v35  ;;  %v1517_v2 = vld [vmem:[%s5212_s6 + $0x18] sm:$0xff]  ;;  %v3687_v35 = vld [vmem:[%s5214_s7] ss:$0 sm:$0xff] }
 0x512   :  { %4060 = vmatpush3.msra.mxu1 %v960_v3  ;;  %4061 = vmatprep.mubr.msk.f32.mxu1 %vm4535_vm1, %v4534_v48  ;;  %v4350_v3 = vpack.c.bf16 %v1517_v2, %v1516_v1 }
 0x513   :  { %4069 = vmatprep.subr.mxu1 %v4534_v48 }
 0x5e3   :  { %v1202_v4 = vpop.f32.mrb[10].mxu0 }
 0x5e4   :  { %v1206_v5 = vmul.f32 0.25, %v1202_v4  ;;  %v1040_v6 = vpop.f32.mrb[10].mxu1  ;;  %v4068_v7 = vpop.f32.mrb[11].mxu0 }
 0x5e5   :  { %v1044_v8 = vmul.f32 0.25, %v1040_v6  ;;  %v4058_v9 = vpop.f32.mrb[11].mxu1 }
 0x5e6   :  { %v1207_v10 = vadd.f32 %v4737_v13, %v1206_v5 }
 0x5e7   :  { %v1045_v11 = vadd.f32 %v4742_v17, %v1044_v8 }
 0x5e8   :  { %v1208_v12 = vsel %vm447_vm3, %v1207_v10, -inf }
 0x5e9   :  { %1209 = vmax.xlane.f32.xlu1 %v1208_v12  ;;  %v1046_v14 = vsel %vm447_vm3, %v1045_v11, -inf }
 0x5ea   :  { %1047 = vmax.xlane.f32.xlu0 %v1046_v14 }
 0x676   :  { %v1210_v15 = vpop.xlane.xlu1 %1209 }
 0x677   :  { %v1211_v16 = vsub.f32 %v1207_v10, %v1210_v15  ;;  %v1048_v18 = vpop.xlane.xlu0 %1047 }
 0x678   :  { %v1049_v19 = vsub.f32 %v1045_v11, %v1048_v18  ;;  %v3685_v11 = vld [vmem:[%s5207_s10 + $0x2] ss:$0 sm:$0xff] }
 0x679   :  { %v1212_v20 = vmul.f32 1.442695, %v1211_v16  ;;  %v3686_v16 = vld [vmem:[%s5207_s10 + $0x3] ss:$0 sm:$0xff] }
 0x67a   :  { %v1050_v21 = vmul.f32 1.442695, %v1049_v19 }
 0x67b   :  { %4486 = vpow2.f32 %v1212_v20 }
 0x67c   :  { %4488 = vpow2.f32 %v1050_v21 }
 0x685   :  { %v4487_v22 = vpop.eup %4486 }
 0x686   :  { %v4489_v23 = vpop.eup %4488  ;;  %v1214_v24 = vsel %vm447_vm3, %v4487_v22, 0.0 }
 0x687   :  { %1215 = vadd.xlane.f32.xlu1 %v1214_v24  ;;  %v1052_v25 = vsel %vm447_vm3, %v4489_v23, 0.0 }
 0x688   :  { %1053 = vadd.xlane.f32.xlu0 %v1052_v25  ;;  %v1626_v25 = vld [vmem:[%s5213_s8 + $0x10] sm:$0xff] }
 0x714   :  { %v1216_v26 = vpop.xlane.xlu1 %1215 }
 0x715   :  { %v1054_v27 = vpop.xlane.xlu0 %1053 }
 0x716   :  { %4490 = vrcp.f32 %v1054_v27 }
 0x717   :  { %4492 = vrcp.f32 %v1216_v26  ;;  %v1627_v26 = vld [vmem:[%s5213_s8 + $0x18] sm:$0xff] }
 0x718   :  { %v4358_v27 = vpack.c.bf16 %v1627_v26, %v1626_v25  ;;  %v3716_v25 = vld [vmem:[%s5206_s2 + $0x158] sm:$0xff] }
 0x720   :  { %v4491_v29 = vpop.eup %4490 }
 0x721   :  { %v1056_v30 = vmul.f32 %v4491_v29, %v4489_v23  ;;  %v4493_v31 = vpop.eup %4492  ;;  %v1625_v23 = vld [vmem:[%s5213_s8 + $0x8] sm:$0xff]  ;;  %v1628_v29 = vld [vmem:[%s5213_s8 + $0x20] sm:$0xff] }
 0x722   :  { %v1218_v32 = vmul.f32 %v4493_v31, %v4487_v22  ;;  %v1624_v22 = vld [vmem:[%s5213_s8] sm:$0xff] }
 0x723   :  { %4062 = vmatmul.mubr.msk.f32.vlgmr.msra.gmra.mrb[12].mxu1 %vm447_vm3, %v1056_v30  ;;  %v4354_v24 = vpack.c.bf16 %v1625_v23, %v1624_v22  ;;  %v1629_v30 = vld [vmem:[%s5213_s8 + $0x28] sm:$0xff]  ;;  %v3700_v22 = vld [vmem:[%s5206_s2 + $0xd8] sm:$0xff] }
 0x724   :  { %4070 = vmatpush3.msra.mxu1 %v4751_v28  ;;  %4071 = vmatprep.mubr.msk.f32.mxu1 %vm4535_vm1, %v4534_v48  ;;  %v702_v28 = vld [vmem:[%s5210_s4] sm:$0xff]  ;;  %v4362_v31 = vpack.c.bf16 %v1629_v30, %v1628_v29  ;;  %v3706_v29 = vld [vmem:[%s5206_s2 + $0x108] sm:$0xff] }
 0x725   :  { %v4342_v37 = vpack.c.bf16 %v703_v36, %v702_v28 }
 0x727   :  { %4072 = vmatmul.mubr.msk.f32.vlgmr.msra.gmra.mrb[14].mxu1 %vm447_vm3, %v1218_v32  ;;  %4343 = vmatprep.subr.bf16.mxu0 %v4342_v37  ;;  %v1630_v32 = vld [vmem:[%s5213_s8 + $0x30] sm:$0xff] }
 0x728   :  { %v4366_v34 = vpack.c.bf16 %v1631_v33, %v1630_v32 }
 0x7f6   :  { %v1126_v38 = vpop.f32.mrb[12].mxu1 }
 0x7f7   :  { %v4063_v39 = vpop.f32.mrb[13].mxu1  ;;  %4078 = vmatprep.mubr.msk.f32.mxu0 %vm361_vm2, %v1126_v38 }
 0x7fa   :  { %v1288_v40 = vpop.f32.mrb[14].mxu1 }
 0x7fb   :  { %v4073_v42 = vpop.f32.mrb[15].mxu1  ;;  %4079 = vmatmul.mubr.msk.f32.vlgmr.msra.gmra.mrb[12].mxu0 %vm361_vm2, %v1288_v40 }
 0x7fc   :  { %4345 = vmatpush3.bf16.msra.mxu0 %v4342_v37  ;;  %4085 = vmatprep.mubr.msk.f32.mxu0 %vm361_vm2, %v4779_v55 }
 0x7fd   :  { %4355 = vmatprep.subr.bf16.mxu0 %v4354_v24 }
 0x803   :  { %4086 = vmatmul.mubr.msk.f32.vlgmr.msra.gmra.mrb[12].mxu0 %vm361_vm2, %v4781_v57 }
 0x804   :  { %4357 = vmatpush3.bf16.msra.mxu0 %v4354_v24  ;;  %v3715_v24 = vld [vmem:[%s5206_s2 + $0x150] sm:$0xff] }
 0x805   :  { %4359 = vmatprep.subr.bf16.mxu0 %v4358_v27  ;;  %v4390_v26 = vpack.c.bf16 %v3716_v25, %v3715_v24 }
 0x808   :  { %4361 = vmatpush3.bf16.msra.mxu0 %v4358_v27  ;;  %v3705_v27 = vld [vmem:[%s5206_s2 + $0x100] sm:$0xff] }
 0x809   :  { %4363 = vmatprep.subr.bf16.mxu0 %v4362_v31  ;;  %v4378_v30 = vpack.c.bf16 %v3706_v29, %v3705_v27  ;;  %v3750_v27 = vld [vmem:[%s5208_s3 + $0xb] ss:$0 sm:$0xff] }
 0x80c   :  { %4365 = vmatpush3.bf16.msra.mxu0 %v4362_v31 }
 0x80d   :  { %4367 = vmatprep.subr.bf16.mxu0 %v4366_v34 }
 0x810   :  { %4369 = vmatpush3.bf16.msra.mxu0 %v4366_v34 }
 0x8d6   :  { %v4087_v44 = vpop.f32.mrb[12].mxu0 }
 0x8d7   :  { %v1465_v45 = vadd.f32 %v4087_v44, %v3682_v43  ;;  %v1448_v47 = vpop.f32.mrb[13].mxu0 }
 0x8d8   :  { %v1464_v49 = vadd.f32 %v3682_v43, %v1448_v47 }
 0x8d9   :  { %v1467_v50 = vadd.f32 %v1465_v45, %v4664_v46 }
 0x8da   :  { %v1466_v51 = vadd.f32 %v1464_v49, %v4652_v41  ;;  %v1514_v41 = vld [vmem:[%s5212_s6] sm:$0xff] }
 0x8db   :  { %v1475_v52 = vsel %vm49_vm0, %v1467_v50, 0.0  ;;  %v4346_v0 = vpack.c.bf16 %v1515_v63, %v1514_v41 }
 0x8dc   :  { %1476 = vadd.xlane.f32.xlu1 %v1475_v52  ;;  %v1472_v53 = vsel %vm49_vm0, %v1466_v51, 0.0 }
 0x8dd   :  { %1473 = vadd.xlane.f32.xlu0 %v1472_v53  ;;  %4347 = vmatprep.subr.bf16.mxu1 %v4346_v0 }
 0x8de   :  { %4349 = vmatpush3.bf16.msra.mxu1 %v4346_v0 }
 0x8df   :  { %4351 = vmatprep.subr.bf16.mxu1 %v4350_v3 }
 0x8e2   :  { %4353 = vmatpush3.bf16.msra.mxu1 %v4350_v3 }
 0x969   :  { %v1477_v54 = vpop.xlane.xlu1 %1476 }
 0x96a   :  { %v1479_v55 = vmul.f32 0.03125, %v1477_v54  ;;  %v1474_v56 = vpop.xlane.xlu0 %1473 }
 0x96b   :  { %v1478_v57 = vmul.f32 0.03125, %v1474_v56 }
 0x96c   :  { %v1481_v58 = vsub.f32 %v1467_v50, %v1479_v55 }
 0x96d   :  { %v1480_v59 = vsub.f32 %v1466_v51, %v1478_v57 }
 0x96e   :  { %v1483_v60 = vmul.f32 %v1481_v58, %v1481_v58 }
 0x96f   :  { %v1482_v61 = vmul.f32 %v1480_v59, %v1480_v59 }
 0x970   :  { %v1487_v62 = vsel %vm49_vm0, %v1483_v60, 0.0  ;;  %v3690_v60 = vld [vmem:[%s5215_s9] ss:$0 sm:$0xff] }
 0x971   :  { %1488 = vadd.xlane.f32.xlu1 %v1487_v62  ;;  %v1484_v46 = vsel %vm49_vm0, %v1482_v61, 0.0 }
 0x972   :  { %1485 = vadd.xlane.f32.xlu0 %v1484_v46 }
 0x9fe   :  { %v1489_v4 = vpop.xlane.xlu1 %1488 }
 0x9ff   :  { %v1491_v5 = vmul.f32 0.03125, %v1489_v4  ;;  %v1486_v6 = vpop.xlane.xlu0 %1485 }
 0xa00   :  { %v1490_v7 = vmul.f32 0.03125, %v1486_v6 }
 0xa01   :  { %v1493_v8 = vadd.f32 1e-05, %v1491_v5 }
 0xa02   :  { %v1492_v9 = vadd.f32 1e-05, %v1490_v7 }
 0xa03   :  { %4494 = vrsqrt.f32 %v1493_v8 }
 0xa04   :  { %4496 = vrsqrt.f32 %v1492_v9 }
 0xa0d   :  { %v4495_v10 = vpop.eup %4494 }
 0xa0e   :  { %v4497_v12 = vpop.eup %4496  ;;  %v1497_v14 = vmul.f32 %v4495_v10, %v1481_v58 }
 0xa0f   :  { %v1496_v15 = vmul.f32 %v4497_v12, %v1480_v59 }
 0xa10   :  { %v1505_v18 = vmul.f32 %v3685_v11, %v1497_v14  ;;  %v3697_v14 = vld [vmem:[%s5206_s2 + $0xc0] sm:$0xff] }
 0xa11   :  { %v1504_v19 = vmul.f32 %v3685_v11, %v1496_v15  ;;  %v3698_v15 = vld [vmem:[%s5206_s2 + $0xc8] sm:$0xff] }
 0xa12   :  { %v1513_v21 = vadd.f32 %v3686_v16, %v1505_v18  ;;  %v3713_v18 = vld [vmem:[%s5206_s2 + $0x140] sm:$0xff] }
 0xa13   :  { %v1512_v20 = vadd.f32 %v3686_v16, %v1504_v19  ;;  %v4370_v16 = vpack.c.bf16 %v3698_v15, %v3697_v14  ;;  %v3714_v19 = vld [vmem:[%s5206_s2 + $0x148] sm:$0xff] }
 0xa15   :  { %4096 = vmatprep.mubr.msk.f32.mxu1 %vm49_vm0, %v1512_v20  ;;  %4371 = vmatprep.subr.bf16.mxu1 %v4370_v16 }
 0xa16   :  { %4097 = vmatmul.mubr.msk.f32.vlgmr.msra.gmra.mrb[16].mxu1 %vm49_vm0, %v1513_v21 }
 0xa17   :  { %4373 = vmatpush3.bf16.msra.mxu1 %v4370_v16 }
 0xae9   :  { %v4098_v28 = vpop.f32.mrb[16].mxu1 }
 0xaea   :  { %v1603_v36 = vadd.f32 %v4098_v28, %v3687_v35  ;;  %v1597_v37 = vpop.f32.mrb[17].mxu1 }
 0xaeb   :  { %v1598_v38 = vadd.f32 %v3687_v35, %v1597_v37  ;;  %v3695_v37 = vld [vmem:[%s5207_s10 + $0x4] ss:$0 sm:$0xff] }
 0xaec   :  { %v1607_v39 = vmul.f32 %v1603_v36, %v1603_v36 }
 0xaed   :  { %v1606_v40 = vmul.f32 %v1598_v38, %v1598_v38 }
 0xaee   :  { %v1609_v42 = vmul.f32 %v1607_v39, %v1603_v36 }
 0xaef   :  { %v1608_v43 = vmul.f32 %v1606_v40, %v1598_v38 }
 0xaf0   :  { %v1611_v44 = vmul.f32 0.044715, %v1609_v42  ;;  %v3696_v42 = vld [vmem:[%s5207_s10 + $0x5] ss:$0 sm:$0xff] }
 0xaf1   :  { %v1610_v45 = vmul.f32 0.044715, %v1608_v43 }
 0xaf2   :  { %v1613_v47 = vadd.f32 %v1611_v44, %v1603_v36 }
 0xaf3   :  { %v1612_v49 = vadd.f32 %v1610_v45, %v1598_v38  ;;  %v3707_v45 = vld [vmem:[%s5206_s2 + $0x110] sm:$0xff] }
 0xaf4   :  { %v1615_v50 = vmul.f32 0.7978846, %v1613_v47  ;;  %v3708_v47 = vld [vmem:[%s5206_s2 + $0x118] sm:$0xff] }
 0xaf5   :  { %v1614_v51 = vmul.f32 0.7978846, %v1612_v49 }
 0xaf6   :  { %4498 = vtanh.f32 %v1615_v50 }
 0xaf7   :  { %4500 = vtanh.f32 %v1614_v51  ;;  %v4382_v51 = vpack.c.bf16 %v3708_v47, %v3707_v45  ;;  %v3738_v45 = vld [vmem:[%s5206_s2 + $0x128] sm:$0xff] }
 0xb00   :  { %v4499_v52 = vpop.eup %4498 }
 0xb01   :  { %v4501_v53 = vpop.eup %4500  ;;  %v1619_v54 = vadd.f32 1.0, %v4499_v52  ;;  %v3718_v52 = vld [vmem:[%s5208_s3 + $0xa] ss:$0 sm:$0xff] }
 0xb02   :  { %v1618_v55 = vadd.f32 1.0, %v4501_v53 }
 0xb03   :  { %v1621_v56 = vmul.f32 0.5, %v1619_v54 }
 0xb04   :  { %v1620_v57 = vmul.f32 0.5, %v1618_v55 }
 0xb05   :  { %v1623_v59 = vmul.f32 %v1621_v56, %v1603_v36 }
 0xb06   :  { %v1622_v58 = vmul.f32 %v1620_v57, %v1598_v38 }
 0xb08   :  { %4115 = vmatprep.mubr.msk.f32.mxu0 %vm1639_vm4, %v1622_v58  ;;  %v3729_v58 = vld [vmem:[%s5206_s2 + $0xe0] sm:$0xff] }
 0xb09   :  { %4116 = vmatmul.mubr.msk.f32.vlgmr.msra.gmra.mrb[14].mxu0 %vm1639_vm4, %v1623_v59  ;;  %v3730_v59 = vld [vmem:[%s5206_s2 + $0xe8] sm:$0xff] }
 0xbdc   :  { %v4117_v61 = vpop.f32.mrb[14].mxu0 }
 0xbdd   :  { %v1718_v62 = vadd.f32 %v4117_v61, %v3690_v60  ;;  %v1712_v46 = vpop.f32.mrb[15].mxu0 }
 0xbde   :  { %v1713_v41 = vadd.f32 %v3690_v60, %v1712_v46  ;;  %v3710_v60 = vld [vmem:[%s5208_s3 + $0x8] ss:$0 sm:$0xff]  ;;  %v3702_v46 = vld [vmem:[%s5208_s3 + $0x6] ss:$0 sm:$0xff] }
 0xbdf   :  { %v1722_v63 = vadd.f32 %v1718_v62, %v1513_v21  ;;  %v3699_v21 = vld [vmem:[%s5206_s2 + $0xd0] sm:$0xff]  ;;  %v4394_v62 = vpack.c.bf16 %v3730_v59, %v3729_v58 }
 0xbe0   :  { %v1721_v0 = vadd.f32 %v1713_v41, %v1512_v20  ;;  %v4386_v20 = vpack.c.bf16 %v3714_v19, %v3713_v18  ;;  %v4374_v23 = vpack.c.bf16 %v3700_v22, %v3699_v21 }
 0xbe1   :  { %v1730_v1 = vsel %vm49_vm0, %v1722_v63, 0.0 }
 0xbe2   :  { %1731 = vadd.xlane.f32.xlu1 %v1730_v1  ;;  %v1727_v2 = vsel %vm49_vm0, %v1721_v0, 0.0  ;;  %4387 = vmatprep.subr.bf16.mxu0 %v4386_v20  ;;  %v3731_v1 = vld [vmem:[%s5206_s2 + $0xf0] sm:$0xff] }
 0xbe3   :  { %1728 = vadd.xlane.f32.xlu0 %v1727_v2  ;;  %4389 = vmatpush3.bf16.msra.mxu0 %v4386_v20  ;;  %v3732_v2 = vld [vmem:[%s5206_s2 + $0xf8] sm:$0xff] }
 0xbe4   :  { %4375 = vmatprep.subr.bf16.mxu1 %v4374_v23  ;;  %4391 = vmatprep.subr.bf16.mxu0 %v4390_v26 }
 0xbe5   :  { %4377 = vmatpush3.bf16.msra.mxu1 %v4374_v23 }
 0xbe6   :  { %4379 = vmatprep.subr.bf16.mxu1 %v4378_v30 }
 0xbe7   :  { %4393 = vmatpush3.bf16.msra.mxu0 %v4390_v26 }
 0xbe8   :  { %4161 = vmatprep.subr.mxu0 %v4534_v48 }
 0xc6f   :  { %v1732_v3 = vpop.xlane.xlu1 %1731 }
 0xc70   :  { %v1734_v4 = vmul.f32 0.03125, %v1732_v3  ;;  %v1729_v5 = vpop.xlane.xlu0 %1728 }
 0xc71   :  { %v1733_v6 = vmul.f32 0.03125, %v1729_v5  ;;  %v4398_v5 = vpack.c.bf16 %v3732_v2, %v3731_v1 }
 0xc72   :  { %v1736_v7 = vsub.f32 %v1722_v63, %v1734_v4 }
 0xc73   :  { %v1735_v8 = vsub.f32 %v1721_v0, %v1733_v6  ;;  %v3745_v6 = vld [vmem:[%s5206_s2 + $0x160] sm:$0xff] }
 0xc74   :  { %v1738_v9 = vmul.f32 %v1736_v7, %v1736_v7 }
 0xc75   :  { %v1737_v10 = vmul.f32 %v1735_v8, %v1735_v8 }
 0xc76   :  { %v1742_v11 = vsel %vm49_vm0, %v1738_v9, 0.0 }
 0xc77   :  { %1743 = vadd.xlane.f32.xlu1 %v1742_v11  ;;  %v1739_v12 = vsel %vm49_vm0, %v1737_v10, 0.0  ;;  %v3747_v10 = vld [vmem:[%s5206_s2 + $0x170] sm:$0xff]  ;;  %v3748_v11 = vld [vmem:[%s5206_s2 + $0x178] sm:$0xff] }
 0xc78   :  { %1740 = vadd.xlane.f32.xlu0 %v1739_v12  ;;  %v4414_v12 = vpack.c.bf16 %v3748_v11, %v3747_v10 }
 0xd04   :  { %v1744_v31 = vpop.xlane.xlu1 %1743 }
 0xd05   :  { %v1746_v32 = vmul.f32 0.03125, %v1744_v31  ;;  %v1741_v33 = vpop.xlane.xlu0 %1740 }
 0xd06   :  { %v1745_v34 = vmul.f32 0.03125, %v1741_v33 }
 0xd07   :  { %v1748_v35 = vadd.f32 1e-05, %v1746_v32 }
 0xd08   :  { %v1747_v28 = vadd.f32 1e-05, %v1745_v34 }
 0xd09   :  { %4502 = vrsqrt.f32 %v1748_v35 }
 0xd0a   :  { %4504 = vrsqrt.f32 %v1747_v28 }
 0xd13   :  { %v4503_v36 = vpop.eup %4502 }
 0xd14   :  { %v4505_v38 = vpop.eup %4504  ;;  %v1752_v39 = vmul.f32 %v4503_v36, %v1736_v7  ;;  %v3746_v7 = vld [vmem:[%s5206_s2 + $0x168] sm:$0xff] }
 0xd15   :  { %v1751_v40 = vmul.f32 %v4505_v38, %v1735_v8  ;;  %v4410_v9 = vpack.c.bf16 %v3746_v7, %v3745_v6 }
 0xd16   :  { %v1760_v43 = vmul.f32 %v3695_v37, %v1752_v39 }
 0xd17   :  { %v1759_v44 = vmul.f32 %v3695_v37, %v1751_v40 }
 0xd18   :  { %v4936_v50 = vadd.f32 %v3696_v42, %v1760_v43 }
 0xd19   :  { %v4934_v49 = vadd.f32 %v3696_v42, %v1759_v44  ;;  %v3737_v44 = vld [vmem:[%s5206_s2 + $0x120] sm:$0xff] }
 0xd1b   :  { %4126 = vmatprep.mubr.msk.f32.mxu1 %vm49_vm0, %v4934_v49  ;;  %4148 = vmatprep.mubr.msk.f32.mxu0 %vm49_vm0, %v4934_v49 }
 0xd1c   :  { %4127 = vmatmul.mubr.msk.f32.vlgmr.msra.gmra.mrb[18].mxu1 %vm49_vm0, %v4936_v50  ;;  %4149 = vmatmul.mubr.msk.f32.vlgmr.msra.gmra.mrb[16].mxu0 %vm49_vm0, %v4936_v50 }
 0xd1d   :  { %4381 = vmatpush3.bf16.msra.mxu1 %v4378_v30  ;;  %4137 = vmatprep.mubr.msk.f32.mxu1 %vm49_vm0, %v4934_v49 }
 0xd1e   :  { %4383 = vmatprep.subr.bf16.mxu1 %v4382_v51  ;;  %4163 = vmatprep.mubr.msk.f32.mxu0 %vm4535_vm1, %v4534_v48 }
 0xd21   :  { %4385 = vmatpush3.bf16.msra.mxu1 %v4382_v51 }
 0xd22   :  { %4151 = vmatprep.subr.mxu1 %v4534_v48 }
 0xd24   :  { %4138 = vmatmul.mubr.msk.f32.vlgmr.msra.gmra.mrb[20].mxu1 %vm49_vm0, %v4936_v50 }
 0xd25   :  { %4153 = vmatprep.mubr.msk.f32.mxu1 %vm4535_vm1, %v4534_v48 }
 0xdef   :  { %v4128_v53 = vpop.f32.mrb[18].mxu1  ;;  %v4150_v54 = vpop.f32.mrb[16].mxu0 }
 0xdf0   :  { %v4958_v55 = vadd.f32 %v4150_v54, %v3718_v52  ;;  %v1854_v56 = vpop.f32.mrb[19].mxu1  ;;  %v2030_v57 = vpop.f32.mrb[17].mxu0  ;;  %v1860_v3 = vadd.f32 %v4128_v53, %v3702_v46  ;;  %v3739_v54 = vld [vmem:[%s5206_s2 + $0x130] sm:$0xff] }
 0xdf1   :  { %v1855_v4 = vadd.f32 %v3702_v46, %v1854_v56  ;;  %v2031_v8 = vadd.f32 %v3718_v52, %v2030_v57  ;;  %v4402_v52 = vpack.c.bf16 %v3738_v45, %v3737_v44  ;;  %v3740_v56 = vld [vmem:[%s5206_s2 + $0x138] sm:$0xff] }
 0xdf2   :  { %v4406_v58 = vpack.c.bf16 %v3740_v56, %v3739_v54 }
 0xdf7   :  { %v4139_v61 = vpop.f32.mrb[20].mxu1 }
 0xdf8   :  { %v1948_v41 = vadd.f32 %v4139_v61, %v3710_v60  ;;  %v1942_v63 = vpop.f32.mrb[21].mxu1 }
 0xdf9   :  { %v1943_v0 = vadd.f32 %v3710_v60, %v1942_v63 }
 0xdfa   :  { %4162 = vmatpush3.xpose.msk.msra.mxu0 %vm361_vm2, %v1948_v41  ;;  %v3734_v41 = vld [vmem:[%s5208_s3 + $0x7] ss:$0 sm:$0xff] }
 0xdfb   :  { %4152 = vmatpush3.xpose.msk.msra.mxu1 %vm361_vm2, %v1943_v0  ;;  %4395 = vmatprep.subr.bf16.mxu0 %v4394_v62 }
 0xdfc   :  { %4156 = vmatprep.subr.mxu1 %v4534_v48 }
 0xdfd   :  { %4164 = vmatmul.mubr.msk.f32.vlgmr.msra.gmra.mrb[18].mxu0 %vm361_vm2, %v1860_v3 }
 0xdfe   :  { %4154 = vmatmul.mubr.msk.f32.vlgmr.msra.gmra.mrb[22].mxu1 %vm361_vm2, %v1855_v4  ;;  %4397 = vmatpush3.bf16.msra.mxu0 %v4394_v62  ;;  %v3742_v62 = vld [vmem:[%s5208_s3 + $0x9] ss:$0 sm:$0xff] }
 0xdff   :  { %4179 = vmatprep.mubr.msk.f32.mxu0 %vm49_vm0, %v4934_v49  ;;  %4157 = vmatpush3.msra.mxu1 %v2031_v8 }
 0xe00   :  { %4399 = vmatprep.subr.bf16.mxu0 %v4398_v5  ;;  %4158 = vmatprep.mubr.msk.f32.mxu1 %vm4535_vm1, %v4534_v48 }
 0xe01   :  { %4166 = vmatprep.subr.mxu1 %v4534_v48 }
 0xe02   :  { %4401 = vmatpush3.bf16.msra.mxu0 %v4398_v5 }
 0xe03   :  { %4411 = vmatprep.subr.bf16.mxu0 %v4410_v9 }
 0xe05   :  { %4180 = vmatmul.mubr.msk.f32.vlgmr.msra.gmra.mrb[20].mxu0 %vm49_vm0, %v4936_v50 }
 0xe06   :  { %4413 = vmatpush3.bf16.msra.mxu0 %v4410_v9  ;;  %4201 = vmatprep.mubr.msk.f32.mxu0 %vm49_vm0, %v4934_v49 }
 0xe07   :  { %4415 = vmatprep.subr.bf16.mxu0 %v4414_v12 }
 0xe0a   :  { %4417 = vmatpush3.bf16.msra.mxu0 %v4414_v12 }
 0xe0b   :  { %4214 = vmatprep.subr.mxu0 %v4534_v48 }
 0xe0d   :  { %4202 = vmatmul.mubr.msk.f32.vlgmr.msra.gmra.mrb[22].mxu0 %vm49_vm0, %v4936_v50 }
 0xe0e   :  { %4216 = vmatprep.mubr.msk.f32.mxu0 %vm4535_vm1, %v4534_v48 }
 0xed0   :  { %v2273_v14 = vpop.f32.mrb[18].mxu0 }
 0xed1   :  { %v2277_v15 = vmul.f32 0.25, %v2273_v14  ;;  %v2111_v16 = vpop.f32.mrb[22].mxu1  ;;  %v4165_v18 = vpop.f32.mrb[19].mxu0 }
 0xed2   :  { %v2115_v19 = vmul.f32 0.25, %v2111_v16  ;;  %v4155_v20 = vpop.f32.mrb[23].mxu1 }
 0xed3   :  { %v2278_v21 = vadd.f32 %v4737_v13, %v2277_v15 }
 0xed4   :  { %v2116_v22 = vadd.f32 %v4742_v17, %v2115_v19 }
 0xed5   :  { %v2279_v23 = vsel %vm447_vm3, %v2278_v21, -inf }
 0xed6   :  { %2280 = vmax.xlane.f32.xlu1 %v2279_v23  ;;  %v2117_v24 = vsel %vm447_vm3, %v2116_v22, -inf }
 0xed7   :  { %2118 = vmax.xlane.f32.xlu0 %v2117_v24 }
 0xed8   :  { %v4181_v25 = vpop.f32.mrb[20].mxu0 }
 0xed9   :  { %v2445_v26 = vpop.f32.mrb[21].mxu0  ;;  %v2451_v2 = vadd.f32 %v4181_v25, %v3734_v41 }
 0xeda   :  { %v2446_v3 = vadd.f32 %v3734_v41, %v2445_v26  ;;  %v3771_v41 = vld [vmem:[%s5212_s6 + $0x20] sm:$0xff] }
 0xee0   :  { %v4203_v29 = vpop.f32.mrb[22].mxu0 }
 0xee1   :  { %v5016_v30 = vadd.f32 %v4203_v29, %v3750_v27  ;;  %v2621_v31 = vpop.f32.mrb[23].mxu0 }
 0xee2   :  { %v2622_v4 = vadd.f32 %v3750_v27, %v2621_v31 }
 0xf63   :  { %v2281_v32 = vpop.xlane.xlu1 %2280 }
 0xf64   :  { %v2282_v33 = vsub.f32 %v2278_v21, %v2281_v32  ;;  %v2119_v34 = vpop.xlane.xlu0 %2118 }
 0xf65   :  { %v2120_v35 = vsub.f32 %v2116_v22, %v2119_v34  ;;  %v3760_v34 = vld [vmem:[%s5210_s4 + $0x38] sm:$0xff] }
 0xf66   :  { %v2283_v28 = vmul.f32 1.442695, %v2282_v33  ;;  %v3759_v33 = vld [vmem:[%s5210_s4 + $0x30] sm:$0xff] }
 0xf67   :  { %v2121_v36 = vmul.f32 1.442695, %v2120_v35  ;;  %v4418_v35 = vpack.c.bf16 %v3760_v34, %v3759_v33  ;;  %v3784_v33 = vld [vmem:[%s5213_s8 + $0x68] sm:$0xff] }
 0xf68   :  { %4506 = vpow2.f32 %v2283_v28 }
 0xf69   :  { %4508 = vpow2.f32 %v2121_v36 }
 0xf72   :  { %v4507_v37 = vpop.eup %4506 }
 0xf73   :  { %v4509_v38 = vpop.eup %4508  ;;  %v2285_v39 = vsel %vm447_vm3, %v4507_v37, 0.0 }
 0xf74   :  { %2286 = vadd.xlane.f32.xlu1 %v2285_v39  ;;  %v2123_v40 = vsel %vm447_vm3, %v4509_v38, 0.0 }
 0xf75   :  { %2124 = vadd.xlane.f32.xlu0 %v2123_v40  ;;  %v3766_v40 = vld [vmem:[%s5211_s5 + $0x1] ss:$0 sm:$0xff] }
0x1001   :  { %v2287_v42 = vpop.xlane.xlu1 %2286 }
0x1002   :  { %v2125_v43 = vpop.xlane.xlu0 %2124 }
0x1003   :  { %4510 = vrcp.f32 %v2125_v43 }
0x1004   :  { %4512 = vrcp.f32 %v2287_v42 }
0x100d   :  { %v4511_v47 = vpop.eup %4510 }
0x100e   :  { %v2127_v51 = vmul.f32 %v4511_v47, %v4509_v38  ;;  %v4513_v53 = vpop.eup %4512 }
0x100f   :  { %v2289_v57 = vmul.f32 %v4513_v53, %v4507_v37 }
0x1010   :  { %4159 = vmatmul.mubr.msk.f32.vlgmr.msra.gmra.mrb[24].mxu1 %vm447_vm3, %v2127_v51 }
0x1011   :  { %4167 = vmatpush3.msra.mxu1 %v4958_v55  ;;  %4168 = vmatprep.mubr.msk.f32.mxu1 %vm4535_vm1, %v4534_v48 }
0x1012   :  { %4403 = vmatprep.subr.bf16.mxu1 %v4402_v52 }
0x1014   :  { %4169 = vmatmul.mubr.msk.f32.vlgmr.msra.gmra.mrb[26].mxu1 %vm447_vm3, %v2289_v57 }
0x1015   :  { %4405 = vmatpush3.bf16.msra.mxu1 %v4402_v52  ;;  %4190 = vmatprep.mubr.msk.f32.mxu1 %vm49_vm0, %v4934_v49 }
0x1016   :  { %4407 = vmatprep.subr.bf16.mxu1 %v4406_v58 }
0x1019   :  { %4409 = vmatpush3.bf16.msra.mxu1 %v4406_v58 }
0x101a   :  { %4204 = vmatprep.subr.mxu1 %v4534_v48 }
0x101c   :  { %4191 = vmatmul.mubr.msk.f32.vlgmr.msra.gmra.mrb[28].mxu1 %vm49_vm0, %v4936_v50 }
0x101d   :  { %4206 = vmatprep.mubr.msk.f32.mxu1 %vm4535_vm1, %v4534_v48 }
0x10e3   :  { %v5044_v55 = vpop.f32.mrb[24].mxu1 }
0x10e4   :  { %v4160_v59 = vpop.f32.mrb[25].mxu1 }
0x10e7   :  { %v5046_v60 = vpop.f32.mrb[26].mxu1 }
0x10e8   :  { %v4170_v61 = vpop.f32.mrb[27].mxu1 }
0x10ef   :  { %v4192_v46 = vpop.f32.mrb[28].mxu1 }
0x10f0   :  { %v2539_v63 = vadd.f32 %v4192_v46, %v3742_v62  ;;  %v2533_v0 = vpop.f32.mrb[29].mxu1 }
0x10f1   :  { %v2534_v1 = vadd.f32 %v3742_v62, %v2533_v0 }
0x10f2   :  { %4215 = vmatpush3.xpose.msk.msra.mxu0 %vm361_vm2, %v2539_v63  ;;  %v3772_v63 = vld [vmem:[%s5212_s6 + $0x28] sm:$0xff] }
0x10f3   :  { %4205 = vmatpush3.xpose.msk.msra.mxu1 %vm361_vm2, %v2534_v1  ;;  %4419 = vmatprep.subr.bf16.mxu0 %v4418_v35  ;;  %v4426_v0 = vpack.c.bf16 %v3772_v63, %v3771_v41  ;;  %v3773_v1 = vld [vmem:[%s5212_s6 + $0x30] sm:$0xff] }
0x10f4   :  { %4209 = vmatprep.subr.mxu1 %v4534_v48 }
0x10f5   :  { %4217 = vmatmul.mubr.msk.f32.vlgmr.msra.gmra.mrb[24].mxu0 %vm361_vm2, %v2451_v2  ;;  %v3774_v2 = vld [vmem:[%s5212_s6 + $0x38] sm:$0xff] }
0x10f6   :  { %4207 = vmatmul.mubr.msk.f32.vlgmr.msra.gmra.mrb[30].mxu1 %vm361_vm2, %v2446_v3  ;;  %4421 = vmatpush3.bf16.msra.mxu0 %v4418_v35  ;;  %v4430_v3 = vpack.c.bf16 %v3774_v2, %v3773_v1  ;;  %v3785_v35 = vld [vmem:[%s5213_s8 + $0x70] sm:$0xff] }
0x10f7   :  { %4210 = vmatpush3.msra.mxu1 %v2622_v4  ;;  %4211 = vmatprep.mubr.msk.f32.mxu1 %vm4535_vm1, %v4534_v48  ;;  %v3795_v4 = vld [vmem:[%s5216_s11 + $0x20] sm:$0xff] }
0x10f8   :  { %4219 = vmatprep.subr.mxu1 %v4534_v48 }
0x11c8   :  { %v2864_v5 = vpop.f32.mrb[24].mxu0 }
0x11c9   :  { %v2868_v6 = vmul.f32 0.25, %v2864_v5  ;;  %v2702_v7 = vpop.f32.mrb[30].mxu1  ;;  %v4218_v8 = vpop.f32.mrb[25].mxu0  ;;  %v3796_v5 = vld [vmem:[%s5216_s11 + $0x28] sm:$0xff] }
0x11ca   :  { %v2706_v9 = vmul.f32 0.25, %v2702_v7  ;;  %v4208_v10 = vpop.f32.mrb[31].mxu1 }
0x11cb   :  { %v2869_v11 = vadd.f32 %v4737_v13, %v2868_v6  ;;  %v4450_v6 = vpack.c.bf16 %v3796_v5, %v3795_v4 }
0x11cc   :  { %v2707_v12 = vadd.f32 %v4742_v17, %v2706_v9 }
0x11cd   :  { %v2870_v14 = vsel %vm447_vm3, %v2869_v11, -inf }
0x11ce   :  { %2871 = vmax.xlane.f32.xlu1 %v2870_v14  ;;  %v2708_v15 = vsel %vm447_vm3, %v2707_v12, -inf }
0x11cf   :  { %2709 = vmax.xlane.f32.xlu0 %v2708_v15  ;;  %v3769_v15 = vld [vmem:[%s5207_s10 + $0x6] ss:$0 sm:$0xff] }
0x125b   :  { %v2872_v16 = vpop.xlane.xlu1 %2871 }
0x125c   :  { %v2873_v18 = vsub.f32 %v2869_v11, %v2872_v16  ;;  %v2710_v19 = vpop.xlane.xlu0 %2709 }
0x125d   :  { %v2711_v20 = vsub.f32 %v2707_v12, %v2710_v19 }
0x125e   :  { %v2874_v21 = vmul.f32 1.442695, %v2873_v18 }
0x125f   :  { %v2712_v22 = vmul.f32 1.442695, %v2711_v20  ;;  %v3770_v20 = vld [vmem:[%s5207_s10 + $0x7] ss:$0 sm:$0xff] }
0x1260   :  { %4514 = vpow2.f32 %v2874_v21 }
0x1261   :  { %4516 = vpow2.f32 %v2712_v22 }
0x126a   :  { %v4515_v23 = vpop.eup %4514 }
0x126b   :  { %v4517_v24 = vpop.eup %4516  ;;  %v2876_v13 = vsel %vm447_vm3, %v4515_v23, 0.0 }
0x126c   :  { %2877 = vadd.xlane.f32.xlu1 %v2876_v13  ;;  %v2714_v17 = vsel %vm447_vm3, %v4517_v24, 0.0 }
0x126d   :  { %2715 = vadd.xlane.f32.xlu0 %v2714_v17 }
0x12f9   :  { %v2878_v25 = vpop.xlane.xlu1 %2877 }
0x12fa   :  { %v2716_v26 = vpop.xlane.xlu0 %2715 }
0x12fb   :  { %4518 = vrcp.f32 %v2716_v26  ;;  %v3779_v26 = vld [vmem:[%s5213_s8 + $0x40] sm:$0xff] }
0x12fc   :  { %4520 = vrcp.f32 %v2878_v25 }
0x1305   :  { %v4519_v27 = vpop.eup %4518 }
0x1306   :  { %v2718_v29 = vmul.f32 %v4519_v27, %v4517_v24  ;;  %v4521_v31 = vpop.eup %4520  ;;  %v3798_v24 = vld [vmem:[%s5216_s11 + $0x38] sm:$0xff]  ;;  %v3780_v27 = vld [vmem:[%s5213_s8 + $0x48] sm:$0xff] }
0x1307   :  { %v2880_v32 = vmul.f32 %v4521_v31, %v4515_v23  ;;  %v3797_v23 = vld [vmem:[%s5216_s11 + $0x30] sm:$0xff]  ;;  %v3782_v31 = vld [vmem:[%s5213_s8 + $0x58] sm:$0xff] }
0x1308   :  { %4212 = vmatmul.mubr.msk.f32.vlgmr.msra.gmra.mrb[32].mxu1 %vm447_vm3, %v2718_v29  ;;  %v4454_v25 = vpack.c.bf16 %v3798_v24, %v3797_v23  ;;  %v4434_v29 = vpack.c.bf16 %v3780_v27, %v3779_v26 }
0x1309   :  { %4220 = vmatpush3.msra.mxu1 %v5016_v30  ;;  %4221 = vmatprep.mubr.msk.f32.mxu1 %vm4535_vm1, %v4534_v48  ;;  %v3727_v30 = vld [vmem:[%s5210_s4 + $0x20] sm:$0xff]  ;;  %v3728_v48 = vld [vmem:[%s5210_s4 + $0x28] sm:$0xff] }
0x130a   :  { %v4422_v28 = vpack.c.bf16 %v3728_v48, %v3727_v30  ;;  %4427 = vmatprep.subr.bf16.mxu1 %v4426_v0  ;;  %v3786_v30 = vld [vmem:[%s5213_s8 + $0x78] sm:$0xff] }
0x130b   :  { %v4446_v48 = vpack.c.bf16 %v3786_v30, %v3785_v35 }
0x130c   :  { %4222 = vmatmul.mubr.msk.f32.vlgmr.msra.gmra.mrb[34].mxu1 %vm447_vm3, %v2880_v32  ;;  %4423 = vmatprep.subr.bf16.mxu0 %v4422_v28  ;;  %v3783_v32 = vld [vmem:[%s5213_s8 + $0x60] sm:$0xff] }
0x130d   :  { %4429 = vmatpush3.bf16.msra.mxu1 %v4426_v0  ;;  %v4442_v34 = vpack.c.bf16 %v3784_v33, %v3783_v32  ;;  %v3794_v33 = vld [vmem:[%s5207_s10 + $0x9] ss:$0 sm:$0xff] }
0x130e   :  { %4431 = vmatprep.subr.bf16.mxu1 %v4430_v3 }
0x1311   :  { %4433 = vmatpush3.bf16.msra.mxu1 %v4430_v3 }
0x1312   :  { %4451 = vmatprep.subr.bf16.mxu1 %v4450_v6 }
0x13db   :  { %v2788_v36 = vpop.f32.mrb[32].mxu1 }
0x13dc   :  { %v4213_v37 = vpop.f32.mrb[33].mxu1  ;;  %4228 = vmatprep.mubr.msk.f32.mxu0 %vm361_vm2, %v2788_v36 }
0x13df   :  { %v2950_v38 = vpop.f32.mrb[34].mxu1 }
0x13e0   :  { %v4223_v39 = vpop.f32.mrb[35].mxu1  ;;  %4229 = vmatmul.mubr.msk.f32.vlgmr.msra.gmra.mrb[26].mxu0 %vm361_vm2, %v2950_v38 }
0x13e1   :  { %4425 = vmatpush3.bf16.msra.mxu0 %v4422_v28  ;;  %4235 = vmatprep.mubr.msk.f32.mxu0 %vm361_vm2, %v5044_v55  ;;  %v3776_v28 = vld [vmem:[%s5214_s7 + $0x1] ss:$0 sm:$0xff] }
0x13e2   :  { %4435 = vmatprep.subr.bf16.mxu0 %v4434_v29 }
0x13e8   :  { %4236 = vmatmul.mubr.msk.f32.vlgmr.msra.gmra.mrb[26].mxu0 %vm361_vm2, %v5046_v60 }
0x13e9   :  { %4437 = vmatpush3.bf16.msra.mxu0 %v4434_v29 }
0x14bb   :  { %v4237_v42 = vpop.f32.mrb[26].mxu0 }
0x14bc   :  { %v3128_v43 = vadd.f32 %v4237_v42, %v3766_v40  ;;  %v3110_v44 = vpop.f32.mrb[27].mxu0 }
0x14bd   :  { %v3127_v45 = vadd.f32 %v3766_v40, %v3110_v44 }
0x14be   :  { %v3130_v47 = vadd.f32 %v3128_v43, %v4936_v50 }
0x14bf   :  { %v3129_v51 = vadd.f32 %v3127_v45, %v4934_v49 }
0x14c0   :  { %v3138_v52 = vsel %vm49_vm0, %v3130_v47, 0.0 }
0x14c1   :  { %3139 = vadd.xlane.f32.xlu1 %v3138_v52  ;;  %v3135_v53 = vsel %vm49_vm0, %v3129_v51, 0.0 }
0x14c2   :  { %3136 = vadd.xlane.f32.xlu0 %v3135_v53 }
0x154e   :  { %v3140_v54 = vpop.xlane.xlu1 %3139 }
0x154f   :  { %v3142_v56 = vmul.f32 0.03125, %v3140_v54  ;;  %v3137_v57 = vpop.xlane.xlu0 %3136 }
0x1550   :  { %v3141_v58 = vmul.f32 0.03125, %v3137_v57 }
0x1551   :  { %v3144_v55 = vsub.f32 %v3130_v47, %v3142_v56 }
0x1552   :  { %v3143_v59 = vsub.f32 %v3129_v51, %v3141_v58 }
0x1553   :  { %v3146_v60 = vmul.f32 %v3144_v55, %v3144_v55 }
0x1554   :  { %v3145_v61 = vmul.f32 %v3143_v59, %v3143_v59 }
0x1555   :  { %v3150_v62 = vsel %vm49_vm0, %v3146_v60, 0.0 }
0x1556   :  { %3151 = vadd.xlane.f32.xlu1 %v3150_v62  ;;  %v3147_v46 = vsel %vm49_vm0, %v3145_v61, 0.0 }
0x1557   :  { %3148 = vadd.xlane.f32.xlu0 %v3147_v46  ;;  %v3788_v46 = vld [vmem:[%s5215_s9 + $0x1] ss:$0 sm:$0xff] }
0x15e3   :  { %v3152_v7 = vpop.xlane.xlu1 %3151 }
0x15e4   :  { %v3154_v8 = vmul.f32 0.03125, %v3152_v7  ;;  %v3149_v9 = vpop.xlane.xlu0 %3148 }
0x15e5   :  { %v3153_v10 = vmul.f32 0.03125, %v3149_v9 }
0x15e6   :  { %v3156_v11 = vadd.f32 1e-05, %v3154_v8 }
0x15e7   :  { %v3155_v12 = vadd.f32 1e-05, %v3153_v10 }
0x15e8   :  { %4522 = vrsqrt.f32 %v3156_v11 }
0x15e9   :  { %4524 = vrsqrt.f32 %v3155_v12 }
0x15f2   :  { %v4523_v14 = vpop.eup %4522 }
0x15f3   :  { %v4525_v16 = vpop.eup %4524  ;;  %v3160_v18 = vmul.f32 %v4523_v14, %v3144_v55 }
0x15f4   :  { %v3159_v19 = vmul.f32 %v4525_v16, %v3143_v59 }
0x15f5   :  { %v3168_v21 = vmul.f32 %v3769_v15, %v3160_v18  ;;  %v3435_v18 = vld [vmem:[%s5216_s11] sm:$0xff] }
0x15f6   :  { %v3167_v22 = vmul.f32 %v3769_v15, %v3159_v19  ;;  %v3436_v19 = vld [vmem:[%s5216_s11 + $0x8] sm:$0xff] }
0x15f7   :  { %v3176_v17 = vadd.f32 %v3770_v20, %v3168_v21  ;;  %v3437_v21 = vld [vmem:[%s5216_s11 + $0x10] sm:$0xff] }
0x15f8   :  { %v5130_v13 = vadd.f32 %v3770_v20, %v3167_v22  ;;  %v4458_v20 = vpack.c.bf16 %v3436_v19, %v3435_v18  ;;  %v3438_v22 = vld [vmem:[%s5216_s11 + $0x18] sm:$0xff] }
0x15f9   :  { %v4462_v23 = vpack.c.bf16 %v3438_v22, %v3437_v21 }
0x15fa   :  { %4246 = vmatprep.mubr.msk.f32.mxu1 %vm49_vm0, %v5130_v13 }
0x15fb   :  { %4247 = vmatmul.mubr.msk.f32.vlgmr.msra.gmra.mrb[36].mxu1 %vm49_vm0, %v3176_v17 }
0x15fc   :  { %4453 = vmatpush3.bf16.msra.mxu1 %v4450_v6  ;;  %4276 = vmatprep.mubr.msk.f32.mxu1 %vm49_vm0, %v4934_v49  ;;  %v3781_v49 = vld [vmem:[%s5213_s8 + $0x50] sm:$0xff] }
0x15fd   :  { %4455 = vmatprep.subr.bf16.mxu1 %v4454_v25 }
0x1600   :  { %4457 = vmatpush3.bf16.msra.mxu1 %v4454_v25 }
0x1601   :  { %4459 = vmatprep.subr.bf16.mxu1 %v4458_v20 }
0x1603   :  { %4277 = vmatmul.mubr.msk.f32.vlgmr.msra.gmra.mrb[38].mxu1 %vm49_vm0, %v4936_v50  ;;  %v4438_v50 = vpack.c.bf16 %v3782_v31, %v3781_v49  ;;  %v3793_v49 = vld [vmem:[%s5207_s10 + $0x8] ss:$0 sm:$0xff] }
0x1604   :  { %4461 = vmatpush3.bf16.msra.mxu1 %v4458_v20 }
0x1605   :  { %4439 = vmatprep.subr.bf16.mxu0 %v4438_v50  ;;  %4463 = vmatprep.subr.bf16.mxu1 %v4462_v23 }
0x1606   :  { %4441 = vmatpush3.bf16.msra.mxu0 %v4438_v50 }
0x1607   :  { %4443 = vmatprep.subr.bf16.mxu0 %v4442_v34 }
0x1608   :  { %4465 = vmatpush3.bf16.msra.mxu1 %v4462_v23 }
0x160a   :  { %4445 = vmatpush3.bf16.msra.mxu0 %v4442_v34 }
0x160b   :  { %4447 = vmatprep.subr.bf16.mxu0 %v4446_v48 }
0x160e   :  { %4449 = vmatpush3.bf16.msra.mxu0 %v4446_v48 }
0x16ce   :  { %v4248_v36 = vpop.f32.mrb[36].mxu1 }
0x16cf   :  { %v3268_v37 = vadd.f32 %v4248_v36, %v3776_v28  ;;  %v3262_v38 = vpop.f32.mrb[37].mxu1 }
0x16d0   :  { %v3263_v39 = vadd.f32 %v3776_v28, %v3262_v38  ;;  %v3803_v28 = vld [vmem:[%s5217_s12] ss:$0 sm:$0xff] }
0x16d1   :  { %v3272_v40 = vmul.f32 %v3268_v37, %v3268_v37 }
0x16d2   :  { %v3271_v42 = vmul.f32 %v3263_v39, %v3263_v39 }
0x16d3   :  { %v3274_v43 = vmul.f32 %v3272_v40, %v3268_v37 }
0x16d4   :  { %v3273_v44 = vmul.f32 %v3271_v42, %v3263_v39 }
0x16d5   :  { %v3276_v45 = vmul.f32 0.044715, %v3274_v43 }
0x16d6   :  { %v3275_v47 = vmul.f32 0.044715, %v3273_v44 }
0x16d7   :  { %v3278_v51 = vadd.f32 %v3276_v45, %v3268_v37 }
0x16d8   :  { %v3277_v52 = vadd.f32 %v3275_v47, %v3263_v39 }
0x16d9   :  { %v3280_v53 = vmul.f32 0.7978846, %v3278_v51 }
0x16da   :  { %v3279_v54 = vmul.f32 0.7978846, %v3277_v52 }
0x16db   :  { %4526 = vtanh.f32 %v3280_v53 }
0x16dc   :  { %4528 = vtanh.f32 %v3279_v54 }
0x16e5   :  { %v4527_v56 = vpop.eup %4526 }
0x16e6   :  { %v4529_v57 = vpop.eup %4528  ;;  %v3284_v58 = vadd.f32 1.0, %v4527_v56 }
0x16e7   :  { %v3283_v55 = vadd.f32 1.0, %v4529_v57 }
0x16e8   :  { %v3286_v59 = vmul.f32 0.5, %v3284_v58 }
0x16e9   :  { %v3285_v60 = vmul.f32 0.5, %v3283_v55 }
0x16ea   :  { %v3288_v62 = vmul.f32 %v3286_v59, %v3268_v37 }
0x16eb   :  { %v3287_v61 = vmul.f32 %v3285_v60, %v3263_v39 }
0x16ed   :  { %4265 = vmatprep.mubr.msk.f32.mxu0 %vm1639_vm4, %v3287_v61 }
0x16ee   :  { %4266 = vmatmul.mubr.msk.f32.vlgmr.msra.gmra.mrb[28].mxu0 %vm1639_vm4, %v3288_v62 }
0x17c1   :  { %v4267_v41 = vpop.f32.mrb[28].mxu0 }
0x17c2   :  { %v3384_v63 = vadd.f32 %v4267_v41, %v3788_v46  ;;  %v3378_v0 = vpop.f32.mrb[29].mxu0 }
0x17c3   :  { %v3379_v1 = vadd.f32 %v3788_v46, %v3378_v0 }
0x17c4   :  { %v3388_v2 = vadd.f32 %v3384_v63, %v3176_v17 }
0x17c5   :  { %v3387_v3 = vadd.f32 %v3379_v1, %v5130_v13 }
0x17c6   :  { %v3396_v4 = vsel %vm49_vm0, %v3388_v2, 0.0 }
0x17c7   :  { %3397 = vadd.xlane.f32.xlu1 %v3396_v4  ;;  %v3393_v5 = vsel %vm49_vm0, %v3387_v3, 0.0 }
0x17c8   :  { %3394 = vadd.xlane.f32.xlu0 %v3393_v5 }
0x1854   :  { %v3398_v6 = vpop.xlane.xlu1 %3397 }
0x1855   :  { %v3400_v7 = vmul.f32 0.03125, %v3398_v6  ;;  %v3395_v8 = vpop.xlane.xlu0 %3394 }
0x1856   :  { %v3399_v9 = vmul.f32 0.03125, %v3395_v8 }
0x1857   :  { %v3402_v10 = vsub.f32 %v3388_v2, %v3400_v7 }
0x1858   :  { %v3401_v11 = vsub.f32 %v3387_v3, %v3399_v9 }
0x1859   :  { %v3404_v12 = vmul.f32 %v3402_v10, %v3402_v10 }
0x185a   :  { %v3403_v14 = vmul.f32 %v3401_v11, %v3401_v11 }
0x185b   :  { %v3408_v15 = vsel %vm49_vm0, %v3404_v12, 0.0 }
0x185c   :  { %3409 = vadd.xlane.f32.xlu1 %v3408_v15  ;;  %v3405_v16 = vsel %vm49_vm0, %v3403_v14, 0.0 }
0x185d   :  { %3406 = vadd.xlane.f32.xlu0 %v3405_v16 }
0x18e9   :  { %v3410_v24 = vpop.xlane.xlu1 %3409 }
0x18ea   :  { %v3412_v13 = vmul.f32 0.03125, %v3410_v24  ;;  %v3407_v17 = vpop.xlane.xlu0 %3406 }
0x18eb   :  { %v3411_v25 = vmul.f32 0.03125, %v3407_v17 }
0x18ec   :  { %v3414_v26 = vadd.f32 1e-05, %v3412_v13 }
0x18ed   :  { %v3413_v27 = vadd.f32 1e-05, %v3411_v25 }
0x18ee   :  { %4530 = vrsqrt.f32 %v3414_v26 }
0x18ef   :  { %4532 = vrsqrt.f32 %v3413_v27 }
0x18f8   :  { %v4531_v29 = vpop.eup %4530 }
0x18f9   :  { %v4533_v31 = vpop.eup %4532  ;;  %v3418_v50 = vmul.f32 %v4531_v29, %v3402_v10 }
0x18fa   :  { %v3417_v32 = vmul.f32 %v4533_v31, %v3401_v11 }
0x18fb   :  { %v3426_v34 = vmul.f32 %v3793_v49, %v3418_v50 }
0x18fc   :  { %v3425_v35 = vmul.f32 %v3793_v49, %v3417_v32 }
0x18fd   :  { %v3434_v48 = vadd.f32 %v3794_v33, %v3426_v34 }
0x18fe   :  { %v3433_v30 = vadd.f32 %v3794_v33, %v3425_v35 }
0x1900   :  { %4287 = vmatprep.mubr.msk.f32.mxu1 %vm49_vm0, %v3433_v30 }
0x1901   :  { %4288 = vmatmul.mubr.msk.f32.vlgmr.msra.gmra.mrb[38].mxu1 %vm49_vm0, %v3434_v48 }
0x19d4   :  { %v4289_v36 = vpop.f32.mrb[38].mxu1 }
0x19d5   :  { %v3608_v37 = vadd.f32 %v4289_v36, %v3803_v28  ;;  %v3591_v38 = vpop.f32.mrb[39].mxu1 }
0x19d6   :  { %v3607_v39 = vadd.f32 %v3803_v28, %v3591_v38 }
0x19d7   :  { %3610 = vst [vmem:[%s5218_s13 + $0x8] sm:$0xff] %v3608_v37 }
0x19d8   :  { %3609 = vst [vmem:[%s5218_s13] sm:$0xff] %v3607_v39 }

</bundles_post_ra>
